<compile_context>
chip_gen: v7x
topology: tpu7x:2x2x1
jax: 0.10.0
libtpu: 0.0.40
codegen_flags: <defaults>
</compile_context>

<pallas_src>
import numpy as np
import jax
import jax.numpy as jnp
from jax import lax
from jax.experimental import pallas as pl
from jax.experimental.pallas import tpu as pltpu

K = 15   # kernel size of the two "conv_15" convolutions
P = 12   # their padding


def _round_up(n, m):
    return ((n + m - 1) // m) * m


def _make_kernel(TB, C_red_p, C_exp_p, L1, Ls_pad, LP2):
    HP = P // 2  # offset of the stride-2 conv1 input inside the even phase

    def kernel(xpe_ref, xpo_ref, w1_ref, b1_ref, w2_ref, b2_ref,
               wc_ref, bc_ref, out_ref, y1pad_ref):
        f32 = jnp.float32
        bf16 = jnp.bfloat16

        # Weights loaded once per grid step; biases broadcast to full lane
        # width OUTSIDE the batch loop (broadcast_in_dim is not CSE'd by JAX).
        w1 = w1_ref[...]
        w2 = w2_ref[...]
        wc = wc_ref[...]
        b1 = jnp.broadcast_to(b1_ref[...], (C_red_p, L1))
        b2 = jnp.broadcast_to(b2_ref[...], (C_red_p, Ls_pad))
        bc = jnp.broadcast_to(bc_ref[...], (C_exp_p, Ls_pad))

        # Zero-padded per-batch staging for y1 (this IS the conv2 padding);
        # only columns [P, P+L1) are rewritten per batch element, the rest
        # stays zero.
        y1pad_ref[...] = jnp.zeros((TB, C_red_p, LP2), f32)

        for b in range(TB):                       # static, TB is small
            # ---- conv1 (k=1, stride=2) + bn1 + relu -------------------------
            # The stride-2 input x[:, ::2] is exactly the even phase of the
            # padded input shifted by P//2, so it is read straight off xpe_ref
            # (no separate strided-input DMA).
            xe = xpe_ref[b, :, HP:HP + L1].astype(bf16)          # (C_in_p, L1)
            y1 = jnp.dot(w1, xe, preferred_element_type=f32)
            y1 = jnp.maximum(y1 + b1, 0.0)                       # (C_red_p, L1)
            y1pad_ref[b, :, P:P + L1] = y1

            # ---- conv2 (k=15, s=1, p=12) + bn2 + relu: ONE tap-stacked matmul
            # The K shifted windows are read directly off the padded staging
            # ref and stacked on sublanes -> contraction depth K*C_red_p.
            a2 = jnp.concatenate(
                [y1pad_ref[b, :, k:k + Ls_pad] for k in range(K)], axis=0)
            y2 = jnp.dot(w2, a2.astype(bf16), preferred_element_type=f32)
            y2 = jnp.maximum(y2 + b2, 0.0)                       # (C_red_p, Ls_pad)

            # ---- conv3 (k=1) + bn3  AND  shortcut (k=15, s=2, p=12) + bn -----
            # fused into ONE deep matmul: operand [y2 ; im2col(x_pad)], weight
            # [W3 | Ws_taps], contraction C_red_p + K*C_in_p.  Stride-2 taps
            # come straight off the even/odd phases of the padded input:
            # x_pad[2t + k] == xpe[t + k//2] (k even) / xpo[t + k//2] (k odd).
            taps = [y2]
            for k in range(K):
                src = xpe_ref if (k % 2 == 0) else xpo_ref
                m = k // 2
                taps.append(src[b, :, m:m + Ls_pad])             # f32 slices
            ac = jnp.concatenate(taps, axis=0)                   # (C_red_p+K*C_in_p, Ls_pad)
            yc = jnp.dot(wc, ac.astype(bf16), preferred_element_type=f32)

            # ---- residual add (done inside the fused matmul) + bias + relu ---
            # Lane-dense full-width store; the wrapper crops channel/lane pad.
            # TODO(synk): the literal PyTorch module yields main-path length
            # L1+10 vs shortcut length Ls = L1+5 (its `x += residual` would
            # raise); we compute/keep only the Ls columns that survive the
            # crop, the extra lane-padding columns are garbage and cropped.
            out_ref[b] = jnp.maximum(yc + bc, 0.0)

    return kernel


def projection_block(x, params):
    """x: (B, C_in, L) float32 -> (B, C_exp, Ls) float32."""
    B, C_in, L = x.shape
    C_red = params["w1"].shape[0]
    C_exp = params["w3"].shape[0]
    eps = 1e-5

    L1 = (L + 1) // 2                       # conv1: k=1, stride=2, pad=0
    Ls = (L + 2 * P - K) // 2 + 1           # shortcut: k=15, stride=2, pad=12
    Ls_pad = _round_up(Ls, 128)             # lane-dense output width
    LP2 = Ls_pad + K - 1                    # padded-y1 staging length
    Lph = (K - 1) // 2 + Ls_pad             # even/odd phase length (padded)

    C_in_p = _round_up(C_in, 8)
    C_red_p = _round_up(C_red, 8)
    C_exp_p = _round_up(C_exp, 8)

    # ---------------- BN (eval) folding into scale/shift ---------------------
    def fold(g, beta, mean, var):
        s = g / jnp.sqrt(var + eps)
        return s, beta - mean * s

    s1, b1 = fold(params["g1"], params["beta1"], params["m1"], params["v1"])
    s2, b2 = fold(params["g2"], params["beta2"], params["m2"], params["v2"])
    s3, b3 = fold(params["g3"], params["beta3"], params["m3"], params["v3"])
    ss, bs = fold(params["gs"], params["betas"], params["ms"], params["vs"])

    bf16 = jnp.bfloat16

    def pad2(w, r, c):
        return jnp.pad(w, ((0, r - w.shape[0]), (0, c - w.shape[1])))

    # k=1 convs: plain (C_out, C_in) folded weights.
    w1s = pad2(s1[:, None] * params["w1"][:, :, 0], C_red_p, C_in_p).astype(bf16)
    w3s = pad2(s3[:, None] * params["w3"][:, :, 0], C_exp_p, C_red_p)

    # k=15 convs: tap-stacked (C_out, K*C_in) weights -> one deep matmul each.
    def stack_taps(w, s, co_p, ci_p):
        wt = jnp.transpose(w, (2, 0, 1)) * s[None, :, None]          # (K, Co, Ci)
        wt = jnp.pad(wt, ((0, 0), (0, co_p - wt.shape[1]), (0, ci_p - wt.shape[2])))
        return jnp.transpose(wt, (1, 0, 2)).reshape(co_p, K * ci_p)

    w2s = stack_taps(params["w2"], s2, C_red_p, C_red_p).astype(bf16)
    wss = stack_taps(params["ws"], ss, C_exp_p, C_in_p)

    # conv3 + shortcut fused into a single matmul: weight [W3 | Ws_taps],
    # bias b3 + bs (the residual add happens inside the MXU accumulation).
    wcs = jnp.concatenate([w3s, wss], axis=1).astype(bf16)   # (C_exp_p, C_red_p+K*C_in_p)

    def padb(v, n):
        return jnp.pad(v, (0, n - v.shape[0]))[:, None]

    b1p = padb(b1, C_red_p)
    b2p = padb(b2, C_red_p)
    bcp = padb(b3, C_exp_p) + padb(bs, C_exp_p)

    # ------ activations: pad channels to 8, split stride-2 phases (f32) ------
    x_p = jnp.pad(x, ((0, 0), (0, C_in_p - C_in), (P, P)))
    xpe = x_p[:, :, 0::2]
    xpo = x_p[:, :, 1::2]
    xpe = jnp.pad(xpe, ((0, 0), (0, 0), (0, Lph - xpe.shape[-1])))
    xpo = jnp.pad(xpo, ((0, 0), (0, 0), (0, Lph - xpo.shape[-1])))

    # Process several batch elements per grid step to amortize per-step
    # pipeline/DMA overhead (largest divisor of B that is <= 8).
    TB = 1
    for d in range(1, min(B, 8) + 1):
        if B % d == 0:
            TB = d
    nb = B // TB

    kernel = _make_kernel(TB, C_red_p, C_exp_p, L1, Ls_pad, LP2)

    out = pl.pallas_call(
        kernel,
        out_shape=jax.ShapeDtypeStruct((B, C_exp_p, Ls_pad), jnp.float32),
        grid_spec=pltpu.PrefetchScalarGridSpec(
            num_scalar_prefetch=0,
            grid=(nb,),
            in_specs=[
                pl.BlockSpec((TB, C_in_p, Lph), lambda i: (i, 0, 0)),
                pl.BlockSpec((TB, C_in_p, Lph), lambda i: (i, 0, 0)),
                pl.BlockSpec((C_red_p, C_in_p), lambda i: (0, 0)),
                pl.BlockSpec((C_red_p, 1), lambda i: (0, 0)),
                pl.BlockSpec((C_red_p, K * C_red_p), lambda i: (0, 0)),
                pl.BlockSpec((C_red_p, 1), lambda i: (0, 0)),
                pl.BlockSpec((C_exp_p, C_red_p + K * C_in_p), lambda i: (0, 0)),
                pl.BlockSpec((C_exp_p, 1), lambda i: (0, 0)),
            ],
            out_specs=pl.BlockSpec((TB, C_exp_p, Ls_pad), lambda i: (i, 0, 0)),
            scratch_shapes=[pltpu.VMEM((TB, C_red_p, LP2), jnp.float32)],
        ),
        compiler_params=pltpu.CompilerParams(
            dimension_semantics=("parallel",),
            vmem_limit_bytes=64 * 1024 * 1024,
        ),
    )(xpe, xpo, w1s, b1p, w2s, b2p, wcs, bcp)

    # Crop the channel / lane padding added for TPU alignment.
    return out[:, :C_exp, :Ls]


def reference(x, p):
    """Pure-JAX reference with PyTorch Conv1d/BatchNorm1d(eval) semantics."""
    eps = 1e-5

    def bn(y, g, b, m, v):
        inv = g / jnp.sqrt(v + eps)
        return y * inv[None, :, None] + (b - m * inv)[None, :, None]

    def conv(z, w, stride, pad):
        return lax.conv_general_dilated(
            z, w, window_strides=(stride,), padding=[(pad, pad)],
            dimension_numbers=("NCH", "OIH", "NCH"),
            precision=lax.Precision.HIGHEST)

    y = jax.nn.relu(bn(conv(x, p["w1"], 2, 0), p["g1"], p["beta1"], p["m1"], p["v1"]))
    y = jax.nn.relu(bn(conv(y, p["w2"], 1, 12), p["g2"], p["beta2"], p["m2"], p["v2"]))
    y = bn(conv(y, p["w3"], 1, 0), p["g3"], p["beta3"], p["m3"], p["v3"])
    r = bn(conv(x, p["ws"], 2, 12), p["gs"], p["betas"], p["ms"], p["vs"])
    Ls = r.shape[-1]
    return jax.nn.relu(y[:, :, :Ls] + r)


if __name__ == "__main__":
    B, C_in, C_red, C_exp, L = 2, 4, 8, 16, 16
    f32 = jnp.float32
    keys = jax.random.split(jax.random.PRNGKey(0), 21)

    def bn_init(c, ks):
        return (1.0 + 0.1 * jax.random.normal(ks[0], (c,), f32),   # gamma
                0.1 * jax.random.normal(ks[1], (c,), f32),          # beta
                0.1 * jax.random.normal(ks[2], (c,), f32),          # running_mean
                0.5 + jax.random.uniform(ks[3], (c,), f32))         # running_var

    g1, beta1, m1, v1 = bn_init(C_red, keys[4:8])
    g2, beta2, m2, v2 = bn_init(C_red, keys[8:12])
    g3, beta3, m3, v3 = bn_init(C_exp, keys[12:16])
    gs, betas, ms, vs = bn_init(C_exp, keys[16:20])

    params = {
        "w1": 0.2 * jax.random.normal(keys[0], (C_red, C_in, 1), f32),
        "w2": 0.1 * jax.random.normal(keys[1], (C_red, C_red, K), f32),
        "w3": 0.2 * jax.random.normal(keys[2], (C_exp, C_red, 1), f32),
        "ws": 0.1 * jax.random.normal(keys[3], (C_exp, C_in, K), f32),
        "g1": g1, "beta1": beta1, "m1": m1, "v1": v1,
        "g2": g2, "beta2": beta2, "m2": m2, "v2": v2,
        "g3": g3, "beta3": beta3, "m3": m3, "v3": v3,
        "gs": gs, "betas": betas, "ms": ms, "vs": vs,
    }

    x = jax.random.normal(keys[20], (B, C_in, L), f32)

    out = projection_block(x, params)
    jax.block_until_ready(out)

    ref = reference(x, params)
    np.testing.assert_allclose(np.asarray(out), np.asarray(ref), rtol=2e-2, atol=2e-2)

    print("KERNEL_OK")
</pallas_src>

<mosaic_0001>
module attributes {stable_mosaic.version = 11 : i64} {
  func.func @kernel(%arg0: i32, %arg1: memref<2x8x135xf32, #tpu.memory_space<vmem>>, %arg2: memref<2x8x135xf32, #tpu.memory_space<vmem>>, %arg3: memref<8x8xbf16, #tpu.memory_space<vmem>>, %arg4: memref<8x1xf32, #tpu.memory_space<vmem>>, %arg5: memref<8x120xbf16, #tpu.memory_space<vmem>>, %arg6: memref<8x1xf32, #tpu.memory_space<vmem>>, %arg7: memref<16x128xbf16, #tpu.memory_space<vmem>>, %arg8: memref<16x1xf32, #tpu.memory_space<vmem>>, %arg9: memref<2x16x128xf32, #tpu.memory_space<vmem>>, %arg10: memref<2x8x142xf32, #tpu.memory_space<vmem>>) attributes {dimension_semantics = [#tpu.dimension_semantics<parallel>], iteration_bounds = array<i64: 1>, scalar_prefetch = 0 : i64, scratch_operands = 1 : i64, tpu.core_type = #tpu.core_type<tc>, window_params = [{transform_indices = @transform_0, window_bounds = array<i64: 2, 8, 135>}, {transform_indices = @transform_1, window_bounds = array<i64: 2, 8, 135>}, {pipeline_mode = #tpu.pipeline_mode<synchronous>, transform_indices = @transform_2, window_bounds = array<i64: 8, 8>}, {pipeline_mode = #tpu.pipeline_mode<synchronous>, transform_indices = @transform_3, window_bounds = array<i64: 8, 1>}, {pipeline_mode = #tpu.pipeline_mode<synchronous>, transform_indices = @transform_4, window_bounds = array<i64: 8, 120>}, {pipeline_mode = #tpu.pipeline_mode<synchronous>, transform_indices = @transform_5, window_bounds = array<i64: 8, 1>}, {pipeline_mode = #tpu.pipeline_mode<synchronous>, transform_indices = @transform_6, window_bounds = array<i64: 16, 128>}, {pipeline_mode = #tpu.pipeline_mode<synchronous>, transform_indices = @transform_7, window_bounds = array<i64: 16, 1>}, {transform_indices = @transform_8, window_bounds = array<i64: 2, 16, 128>}]} {
    %c0 = arith.constant 0 : index
    %c0_0 = arith.constant 0 : index
    %0 = vector.load %arg3[%c0, %c0_0] : memref<8x8xbf16, #tpu.memory_space<vmem>>, vector<8x8xbf16>
    %c0_1 = arith.constant 0 : index
    %c0_2 = arith.constant 0 : index
    %1 = vector.load %arg5[%c0_1, %c0_2] : memref<8x120xbf16, #tpu.memory_space<vmem>>, vector<8x120xbf16>
    %c0_3 = arith.constant 0 : index
    %c0_4 = arith.constant 0 : index
    %2 = vector.load %arg7[%c0_3, %c0_4] : memref<16x128xbf16, #tpu.memory_space<vmem>>, vector<16x128xbf16>
    %c0_5 = arith.constant 0 : index
    %c0_6 = arith.constant 0 : index
    %3 = vector.load %arg4[%c0_5, %c0_6] : memref<8x1xf32, #tpu.memory_space<vmem>>, vector<8x1xf32>
    %4 = vector.shape_cast %3 : vector<8x1xf32> to vector<8x1xf32>
    %5 = vector.broadcast %4 : vector<8x1xf32> to vector<8x8xf32>
    %c0_7 = arith.constant 0 : index
    %c0_8 = arith.constant 0 : index
    %6 = vector.load %arg6[%c0_7, %c0_8] : memref<8x1xf32, #tpu.memory_space<vmem>>, vector<8x1xf32>
    %7 = vector.shape_cast %6 : vector<8x1xf32> to vector<8x1xf32>
    %8 = vector.broadcast %7 : vector<8x1xf32> to vector<8x128xf32>
    %c0_9 = arith.constant 0 : index
    %c0_10 = arith.constant 0 : index
    %9 = vector.load %arg8[%c0_9, %c0_10] : memref<16x1xf32, #tpu.memory_space<vmem>>, vector<16x1xf32>
    %10 = vector.shape_cast %9 : vector<16x1xf32> to vector<16x1xf32>
    %11 = vector.broadcast %10 : vector<16x1xf32> to vector<16x128xf32>
    %cst = arith.constant 0.000000e+00 : f32
    %12 = vector.broadcast %cst : f32 to vector<2x8x142xf32>
    %c0_11 = arith.constant 0 : index
    %c0_12 = arith.constant 0 : index
    %c0_13 = arith.constant 0 : index
    %13 = vector.load %arg10[%c0_11, %c0_12, %c0_13] : memref<2x8x142xf32, #tpu.memory_space<vmem>>, vector<2x8x142xf32>
    tpu.vector_store %arg10[%c0_11, %c0_12, %c0_13], %12 {strides = array<i32>} : memref<2x8x142xf32, #tpu.memory_space<vmem>>, vector<2x8x142xf32>,
    %c0_14 = arith.constant 0 : index
    %c0_15 = arith.constant 0 : index
    %c6 = arith.constant 6 : index
    %14 = vector.load %arg1[%c0_14, %c0_15, %c6] : memref<2x8x135xf32, #tpu.memory_space<vmem>>, vector<1x8x8xf32>
    %15 = vector.shape_cast %14 : vector<1x8x8xf32> to vector<8x8xf32>
    %16 = arith.truncf %15 : vector<8x8xf32> to vector<8x8xbf16>
    %cst_16 = arith.constant dense<0.000000e+00> : vector<8x8xf32>
    %17 = tpu.matmul %0, %16, %cst_16 {dimension_numbers = #tpu.dot_dimension_numbers<[1], [0], [0], [1], [0, 0, 1, 1], [], []>} : vector<8x8xbf16>, vector<8x8xbf16>, vector<8x8xf32> -> vector<8x8xf32>
    %18 = arith.addf %17, %5 : vector<8x8xf32>
    %cst_17 = arith.constant 0.000000e+00 : f32
    %19 = vector.broadcast %cst_17 : f32 to vector<8x8xf32>
    %20 = arith.maximumf %18, %19 : vector<8x8xf32>
    %c0_18 = arith.constant 0 : index
    %c0_19 = arith.constant 0 : index
    %c12 = arith.constant 12 : index
    %21 = vector.load %arg10[%c0_18, %c0_19, %c12] : memref<2x8x142xf32, #tpu.memory_space<vmem>>, vector<1x8x8xf32>
    %22 = vector.shape_cast %21 : vector<1x8x8xf32> to vector<8x8xf32>
    %23 = vector.shape_cast %20 : vector<8x8xf32> to vector<1x8x8xf32>
    tpu.vector_store %arg10[%c0_18, %c0_19, %c12], %23 {strides = array<i32>} : memref<2x8x142xf32, #tpu.memory_space<vmem>>, vector<1x8x8xf32>,
    %c0_20 = arith.constant 0 : index
    %c0_21 = arith.constant 0 : index
    %c0_22 = arith.constant 0 : index
    %24 = vector.load %arg10[%c0_20, %c0_21, %c0_22] : memref<2x8x142xf32, #tpu.memory_space<vmem>>, vector<1x8x128xf32>
    %25 = vector.shape_cast %24 : vector<1x8x128xf32> to vector<8x128xf32>
    %c0_23 = arith.constant 0 : index
    %c0_24 = arith.constant 0 : index
    %c1 = arith.constant 1 : index
    %26 = vector.load %arg10[%c0_23, %c0_24, %c1] : memref<2x8x142xf32, #tpu.memory_space<vmem>>, vector<1x8x128xf32>
    %27 = vector.shape_cast %26 : vector<1x8x128xf32> to vector<8x128xf32>
    %c0_25 = arith.constant 0 : index
    %c0_26 = arith.constant 0 : index
    %c2 = arith.constant 2 : index
    %28 = vector.load %arg10[%c0_25, %c0_26, %c2] : memref<2x8x142xf32, #tpu.memory_space<vmem>>, vector<1x8x128xf32>
    %29 = vector.shape_cast %28 : vector<1x8x128xf32> to vector<8x128xf32>
    %c0_27 = arith.constant 0 : index
    %c0_28 = arith.constant 0 : index
    %c3 = arith.constant 3 : index
    %30 = vector.load %arg10[%c0_27, %c0_28, %c3] : memref<2x8x142xf32, #tpu.memory_space<vmem>>, vector<1x8x128xf32>
    %31 = vector.shape_cast %30 : vector<1x8x128xf32> to vector<8x128xf32>
    %c0_29 = arith.constant 0 : index
    %c0_30 = arith.constant 0 : index
    %c4 = arith.constant 4 : index
    %32 = vector.load %arg10[%c0_29, %c0_30, %c4] : memref<2x8x142xf32, #tpu.memory_space<vmem>>, vector<1x8x128xf32>
    %33 = vector.shape_cast %32 : vector<1x8x128xf32> to vector<8x128xf32>
    %c0_31 = arith.constant 0 : index
    %c0_32 = arith.constant 0 : index
    %c5 = arith.constant 5 : index
    %34 = vector.load %arg10[%c0_31, %c0_32, %c5] : memref<2x8x142xf32, #tpu.memory_space<vmem>>, vector<1x8x128xf32>
    %35 = vector.shape_cast %34 : vector<1x8x128xf32> to vector<8x128xf32>
    %c0_33 = arith.constant 0 : index
    %c0_34 = arith.constant 0 : index
    %c6_35 = arith.constant 6 : index
    %36 = vector.load %arg10[%c0_33, %c0_34, %c6_35] : memref<2x8x142xf32, #tpu.memory_space<vmem>>, vector<1x8x128xf32>
    %37 = vector.shape_cast %36 : vector<1x8x128xf32> to vector<8x128xf32>
    %c0_36 = arith.constant 0 : index
    %c0_37 = arith.constant 0 : index
    %c7 = arith.constant 7 : index
    %38 = vector.load %arg10[%c0_36, %c0_37, %c7] : memref<2x8x142xf32, #tpu.memory_space<vmem>>, vector<1x8x128xf32>
    %39 = vector.shape_cast %38 : vector<1x8x128xf32> to vector<8x128xf32>
    %c0_38 = arith.constant 0 : index
    %c0_39 = arith.constant 0 : index
    %c8 = arith.constant 8 : index
    %40 = vector.load %arg10[%c0_38, %c0_39, %c8] : memref<2x8x142xf32, #tpu.memory_space<vmem>>, vector<1x8x128xf32>
    %41 = vector.shape_cast %40 : vector<1x8x128xf32> to vector<8x128xf32>
    %c0_40 = arith.constant 0 : index
    %c0_41 = arith.constant 0 : index
    %c9 = arith.constant 9 : index
    %42 = vector.load %arg10[%c0_40, %c0_41, %c9] : memref<2x8x142xf32, #tpu.memory_space<vmem>>, vector<1x8x128xf32>
    %43 = vector.shape_cast %42 : vector<1x8x128xf32> to vector<8x128xf32>
    %c0_42 = arith.constant 0 : index
    %c0_43 = arith.constant 0 : index
    %c10 = arith.constant 10 : index
    %44 = vector.load %arg10[%c0_42, %c0_43, %c10] : memref<2x8x142xf32, #tpu.memory_space<vmem>>, vector<1x8x128xf32>
    %45 = vector.shape_cast %44 : vector<1x8x128xf32> to vector<8x128xf32>
    %c0_44 = arith.constant 0 : index
    %c0_45 = arith.constant 0 : index
    %c11 = arith.constant 11 : index
    %46 = vector.load %arg10[%c0_44, %c0_45, %c11] : memref<2x8x142xf32, #tpu.memory_space<vmem>>, vector<1x8x128xf32>
    %47 = vector.shape_cast %46 : vector<1x8x128xf32> to vector<8x128xf32>
    %c0_46 = arith.constant 0 : index
    %c0_47 = arith.constant 0 : index
    %c12_48 = arith.constant 12 : index
    %48 = vector.load %arg10[%c0_46, %c0_47, %c12_48] : memref<2x8x142xf32, #tpu.memory_space<vmem>>, vector<1x8x128xf32>
    %49 = vector.shape_cast %48 : vector<1x8x128xf32> to vector<8x128xf32>
    %c0_49 = arith.constant 0 : index
    %c0_50 = arith.constant 0 : index
    %c13 = arith.constant 13 : index
    %50 = vector.load %arg10[%c0_49, %c0_50, %c13] : memref<2x8x142xf32, #tpu.memory_space<vmem>>, vector<1x8x128xf32>
    %51 = vector.shape_cast %50 : vector<1x8x128xf32> to vector<8x128xf32>
    %c0_51 = arith.constant 0 : index
    %c0_52 = arith.constant 0 : index
    %c14 = arith.constant 14 : index
    %52 = vector.load %arg10[%c0_51, %c0_52, %c14] : memref<2x8x142xf32, #tpu.memory_space<vmem>>, vector<1x8x128xf32>
    %53 = vector.shape_cast %52 : vector<1x8x128xf32> to vector<8x128xf32>
    %54 = tpu.concatenate %25, %27, %29, %31, %33, %35, %37, %39, %41, %43, %45, %47, %49, %51, %53 in 0 : vector<8x128xf32>, vector<8x128xf32>, vector<8x128xf32>, vector<8x128xf32>, vector<8x128xf32>, vector<8x128xf32>, vector<8x128xf32>, vector<8x128xf32>, vector<8x128xf32>, vector<8x128xf32>, vector<8x128xf32>, vector<8x128xf32>, vector<8x128xf32>, vector<8x128xf32>, vector<8x128xf32> -> vector<120x128xf32>
    %55 = arith.truncf %54 : vector<120x128xf32> to vector<120x128xbf16>
    %cst_53 = arith.constant dense<0.000000e+00> : vector<8x128xf32>
    %56 = tpu.matmul %1, %55, %cst_53 {dimension_numbers = #tpu.dot_dimension_numbers<[1], [0], [0], [1], [0, 0, 1, 1], [], []>} : vector<8x120xbf16>, vector<120x128xbf16>, vector<8x128xf32> -> vector<8x128xf32>
    %57 = arith.addf %56, %8 : vector<8x128xf32>
    %cst_54 = arith.constant 0.000000e+00 : f32
    %58 = vector.broadcast %cst_54 : f32 to vector<8x128xf32>
    %59 = arith.maximumf %57, %58 : vector<8x128xf32>
    %c0_55 = arith.constant 0 : index
    %c0_56 = arith.constant 0 : index
    %c0_57 = arith.constant 0 : index
    %60 = vector.load %arg1[%c0_55, %c0_56, %c0_57] : memref<2x8x135xf32, #tpu.memory_space<vmem>>, vector<1x8x128xf32>
    %61 = vector.shape_cast %60 : vector<1x8x128xf32> to vector<8x128xf32>
    %c0_58 = arith.constant 0 : index
    %c0_59 = arith.constant 0 : index
    %c0_60 = arith.constant 0 : index
    %62 = vector.load %arg2[%c0_58, %c0_59, %c0_60] : memref<2x8x135xf32, #tpu.memory_space<vmem>>, vector<1x8x128xf32>
    %63 = vector.shape_cast %62 : vector<1x8x128xf32> to vector<8x128xf32>
    %c0_61 = arith.constant 0 : index
    %c0_62 = arith.constant 0 : index
    %c1_63 = arith.constant 1 : index
    %64 = vector.load %arg1[%c0_61, %c0_62, %c1_63] : memref<2x8x135xf32, #tpu.memory_space<vmem>>, vector<1x8x128xf32>
    %65 = vector.shape_cast %64 : vector<1x8x128xf32> to vector<8x128xf32>
    %c0_64 = arith.constant 0 : index
    %c0_65 = arith.constant 0 : index
    %c1_66 = arith.constant 1 : index
    %66 = vector.load %arg2[%c0_64, %c0_65, %c1_66] : memref<2x8x135xf32, #tpu.memory_space<vmem>>, vector<1x8x128xf32>
    %67 = vector.shape_cast %66 : vector<1x8x128xf32> to vector<8x128xf32>
    %c0_67 = arith.constant 0 : index
    %c0_68 = arith.constant 0 : index
    %c2_69 = arith.constant 2 : index
    %68 = vector.load %arg1[%c0_67, %c0_68, %c2_69] : memref<2x8x135xf32, #tpu.memory_space<vmem>>, vector<1x8x128xf32>
    %69 = vector.shape_cast %68 : vector<1x8x128xf32> to vector<8x128xf32>
    %c0_70 = arith.constant 0 : index
    %c0_71 = arith.constant 0 : index
    %c2_72 = arith.constant 2 : index
    %70 = vector.load %arg2[%c0_70, %c0_71, %c2_72] : memref<2x8x135xf32, #tpu.memory_space<vmem>>, vector<1x8x128xf32>
    %71 = vector.shape_cast %70 : vector<1x8x128xf32> to vector<8x128xf32>
    %c0_73 = arith.constant 0 : index
    %c0_74 = arith.constant 0 : index
    %c3_75 = arith.constant 3 : index
    %72 = vector.load %arg1[%c0_73, %c0_74, %c3_75] : memref<2x8x135xf32, #tpu.memory_space<vmem>>, vector<1x8x128xf32>
    %73 = vector.shape_cast %72 : vector<1x8x128xf32> to vector<8x128xf32>
    %c0_76 = arith.constant 0 : index
    %c0_77 = arith.constant 0 : index
    %c3_78 = arith.constant 3 : index
    %74 = vector.load %arg2[%c0_76, %c0_77, %c3_78] : memref<2x8x135xf32, #tpu.memory_space<vmem>>, vector<1x8x128xf32>
    %75 = vector.shape_cast %74 : vector<1x8x128xf32> to vector<8x128xf32>
    %c0_79 = arith.constant 0 : index
    %c0_80 = arith.constant 0 : index
    %c4_81 = arith.constant 4 : index
    %76 = vector.load %arg1[%c0_79, %c0_80, %c4_81] : memref<2x8x135xf32, #tpu.memory_space<vmem>>, vector<1x8x128xf32>
    %77 = vector.shape_cast %76 : vector<1x8x128xf32> to vector<8x128xf32>
    %c0_82 = arith.constant 0 : index
    %c0_83 = arith.constant 0 : index
    %c4_84 = arith.constant 4 : index
    %78 = vector.load %arg2[%c0_82, %c0_83, %c4_84] : memref<2x8x135xf32, #tpu.memory_space<vmem>>, vector<1x8x128xf32>
    %79 = vector.shape_cast %78 : vector<1x8x128xf32> to vector<8x128xf32>
    %c0_85 = arith.constant 0 : index
    %c0_86 = arith.constant 0 : index
    %c5_87 = arith.constant 5 : index
    %80 = vector.load %arg1[%c0_85, %c0_86, %c5_87] : memref<2x8x135xf32, #tpu.memory_space<vmem>>, vector<1x8x128xf32>
    %81 = vector.shape_cast %80 : vector<1x8x128xf32> to vector<8x128xf32>
    %c0_88 = arith.constant 0 : index
    %c0_89 = arith.constant 0 : index
    %c5_90 = arith.constant 5 : index
    %82 = vector.load %arg2[%c0_88, %c0_89, %c5_90] : memref<2x8x135xf32, #tpu.memory_space<vmem>>, vector<1x8x128xf32>
    %83 = vector.shape_cast %82 : vector<1x8x128xf32> to vector<8x128xf32>
    %c0_91 = arith.constant 0 : index
    %c0_92 = arith.constant 0 : index
    %c6_93 = arith.constant 6 : index
    %84 = vector.load %arg1[%c0_91, %c0_92, %c6_93] : memref<2x8x135xf32, #tpu.memory_space<vmem>>, vector<1x8x128xf32>
    %85 = vector.shape_cast %84 : vector<1x8x128xf32> to vector<8x128xf32>
    %c0_94 = arith.constant 0 : index
    %c0_95 = arith.constant 0 : index
    %c6_96 = arith.constant 6 : index
    %86 = vector.load %arg2[%c0_94, %c0_95, %c6_96] : memref<2x8x135xf32, #tpu.memory_space<vmem>>, vector<1x8x128xf32>
    %87 = vector.shape_cast %86 : vector<1x8x128xf32> to vector<8x128xf32>
    %c0_97 = arith.constant 0 : index
    %c0_98 = arith.constant 0 : index
    %c7_99 = arith.constant 7 : index
    %88 = vector.load %arg1[%c0_97, %c0_98, %c7_99] : memref<2x8x135xf32, #tpu.memory_space<vmem>>, vector<1x8x128xf32>
    %89 = vector.shape_cast %88 : vector<1x8x128xf32> to vector<8x128xf32>
    %90 = tpu.concatenate %59, %61, %63, %65, %67, %69, %71, %73, %75, %77, %79, %81, %83, %85, %87, %89 in 0 : vector<8x128xf32>, vector<8x128xf32>, vector<8x128xf32>, vector<8x128xf32>, vector<8x128xf32>, vector<8x128xf32>, vector<8x128xf32>, vector<8x128xf32>, vector<8x128xf32>, vector<8x128xf32>, vector<8x128xf32>, vector<8x128xf32>, vector<8x128xf32>, vector<8x128xf32>, vector<8x128xf32>, vector<8x128xf32> -> vector<128x128xf32>
    %91 = arith.truncf %90 : vector<128x128xf32> to vector<128x128xbf16>
    %cst_100 = arith.constant dense<0.000000e+00> : vector<16x128xf32>
    %92 = tpu.matmul %2, %91, %cst_100 {dimension_numbers = #tpu.dot_dimension_numbers<[1], [0], [0], [1], [0, 0, 1, 1], [], []>} : vector<16x128xbf16>, vector<128x128xbf16>, vector<16x128xf32> -> vector<16x128xf32>
    %93 = arith.addf %92, %11 : vector<16x128xf32>
    %cst_101 = arith.constant 0.000000e+00 : f32
    %94 = vector.broadcast %cst_101 : f32 to vector<16x128xf32>
    %95 = arith.maximumf %93, %94 : vector<16x128xf32>
    %c0_102 = arith.constant 0 : index
    %c0_103 = arith.constant 0 : index
    %c0_104 = arith.constant 0 : index
    %96 = vector.load %arg9[%c0_102, %c0_103, %c0_104] : memref<2x16x128xf32, #tpu.memory_space<vmem>>, vector<1x16x128xf32>
    %97 = vector.shape_cast %96 : vector<1x16x128xf32> to vector<16x128xf32>
    %98 = vector.shape_cast %95 : vector<16x128xf32> to vector<1x16x128xf32>
    tpu.vector_store %arg9[%c0_102, %c0_103, %c0_104], %98 {strides = array<i32>} : memref<2x16x128xf32, #tpu.memory_space<vmem>>, vector<1x16x128xf32>,
    %c1_105 = arith.constant 1 : index
    %c0_106 = arith.constant 0 : index
    %c6_107 = arith.constant 6 : index
    %99 = vector.load %arg1[%c1_105, %c0_106, %c6_107] : memref<2x8x135xf32, #tpu.memory_space<vmem>>, vector<1x8x8xf32>
    %100 = vector.shape_cast %99 : vector<1x8x8xf32> to vector<8x8xf32>
    %101 = arith.truncf %100 : vector<8x8xf32> to vector<8x8xbf16>
    %cst_108 = arith.constant dense<0.000000e+00> : vector<8x8xf32>
    %102 = tpu.matmul %0, %101, %cst_108 {dimension_numbers = #tpu.dot_dimension_numbers<[1], [0], [0], [1], [0, 0, 1, 1], [], []>} : vector<8x8xbf16>, vector<8x8xbf16>, vector<8x8xf32> -> vector<8x8xf32>
    %103 = arith.addf %102, %5 : vector<8x8xf32>
    %cst_109 = arith.constant 0.000000e+00 : f32
    %104 = vector.broadcast %cst_109 : f32 to vector<8x8xf32>
    %105 = arith.maximumf %103, %104 : vector<8x8xf32>
    %c1_110 = arith.constant 1 : index
    %c0_111 = arith.constant 0 : index
    %c12_112 = arith.constant 12 : index
    %106 = vector.load %arg10[%c1_110, %c0_111, %c12_112] : memref<2x8x142xf32, #tpu.memory_space<vmem>>, vector<1x8x8xf32>
    %107 = vector.shape_cast %106 : vector<1x8x8xf32> to vector<8x8xf32>
    %108 = vector.shape_cast %105 : vector<8x8xf32> to vector<1x8x8xf32>
    tpu.vector_store %arg10[%c1_110, %c0_111, %c12_112], %108 {strides = array<i32>} : memref<2x8x142xf32, #tpu.memory_space<vmem>>, vector<1x8x8xf32>,
    %c1_113 = arith.constant 1 : index
    %c0_114 = arith.constant 0 : index
    %c0_115 = arith.constant 0 : index
    %109 = vector.load %arg10[%c1_113, %c0_114, %c0_115] : memref<2x8x142xf32, #tpu.memory_space<vmem>>, vector<1x8x128xf32>
    %110 = vector.shape_cast %109 : vector<1x8x128xf32> to vector<8x128xf32>
    %c1_116 = arith.constant 1 : index
    %c0_117 = arith.constant 0 : index
    %c1_118 = arith.constant 1 : index
    %111 = vector.load %arg10[%c1_116, %c0_117, %c1_118] : memref<2x8x142xf32, #tpu.memory_space<vmem>>, vector<1x8x128xf32>
    %112 = vector.shape_cast %111 : vector<1x8x128xf32> to vector<8x128xf32>
    %c1_119 = arith.constant 1 : index
    %c0_120 = arith.constant 0 : index
    %c2_121 = arith.constant 2 : index
    %113 = vector.load %arg10[%c1_119, %c0_120, %c2_121] : memref<2x8x142xf32, #tpu.memory_space<vmem>>, vector<1x8x128xf32>
    %114 = vector.shape_cast %113 : vector<1x8x128xf32> to vector<8x128xf32>
    %c1_122 = arith.constant 1 : index
    %c0_123 = arith.constant 0 : index
    %c3_124 = arith.constant 3 : index
    %115 = vector.load %arg10[%c1_122, %c0_123, %c3_124] : memref<2x8x142xf32, #tpu.memory_space<vmem>>, vector<1x8x128xf32>
    %116 = vector.shape_cast %115 : vector<1x8x128xf32> to vector<8x128xf32>
    %c1_125 = arith.constant 1 : index
    %c0_126 = arith.constant 0 : index
    %c4_127 = arith.constant 4 : index
    %117 = vector.load %arg10[%c1_125, %c0_126, %c4_127] : memref<2x8x142xf32, #tpu.memory_space<vmem>>, vector<1x8x128xf32>
    %118 = vector.shape_cast %117 : vector<1x8x128xf32> to vector<8x128xf32>
    %c1_128 = arith.constant 1 : index
    %c0_129 = arith.constant 0 : index
    %c5_130 = arith.constant 5 : index
    %119 = vector.load %arg10[%c1_128, %c0_129, %c5_130] : memref<2x8x142xf32, #tpu.memory_space<vmem>>, vector<1x8x128xf32>
    %120 = vector.shape_cast %119 : vector<1x8x128xf32> to vector<8x128xf32>
    %c1_131 = arith.constant 1 : index
    %c0_132 = arith.constant 0 : index
    %c6_133 = arith.constant 6 : index
    %121 = vector.load %arg10[%c1_131, %c0_132, %c6_133] : memref<2x8x142xf32, #tpu.memory_space<vmem>>, vector<1x8x128xf32>
    %122 = vector.shape_cast %121 : vector<1x8x128xf32> to vector<8x128xf32>
    %c1_134 = arith.constant 1 : index
    %c0_135 = arith.constant 0 : index
    %c7_136 = arith.constant 7 : index
    %123 = vector.load %arg10[%c1_134, %c0_135, %c7_136] : memref<2x8x142xf32, #tpu.memory_space<vmem>>, vector<1x8x128xf32>
    %124 = vector.shape_cast %123 : vector<1x8x128xf32> to vector<8x128xf32>
    %c1_137 = arith.constant 1 : index
    %c0_138 = arith.constant 0 : index
    %c8_139 = arith.constant 8 : index
    %125 = vector.load %arg10[%c1_137, %c0_138, %c8_139] : memref<2x8x142xf32, #tpu.memory_space<vmem>>, vector<1x8x128xf32>
    %126 = vector.shape_cast %125 : vector<1x8x128xf32> to vector<8x128xf32>
    %c1_140 = arith.constant 1 : index
    %c0_141 = arith.constant 0 : index
    %c9_142 = arith.constant 9 : index
    %127 = vector.load %arg10[%c1_140, %c0_141, %c9_142] : memref<2x8x142xf32, #tpu.memory_space<vmem>>, vector<1x8x128xf32>
    %128 = vector.shape_cast %127 : vector<1x8x128xf32> to vector<8x128xf32>
    %c1_143 = arith.constant 1 : index
    %c0_144 = arith.constant 0 : index
    %c10_145 = arith.constant 10 : index
    %129 = vector.load %arg10[%c1_143, %c0_144, %c10_145] : memref<2x8x142xf32, #tpu.memory_space<vmem>>, vector<1x8x128xf32>
    %130 = vector.shape_cast %129 : vector<1x8x128xf32> to vector<8x128xf32>
    %c1_146 = arith.constant 1 : index
    %c0_147 = arith.constant 0 : index
    %c11_148 = arith.constant 11 : index
    %131 = vector.load %arg10[%c1_146, %c0_147, %c11_148] : memref<2x8x142xf32, #tpu.memory_space<vmem>>, vector<1x8x128xf32>
    %132 = vector.shape_cast %131 : vector<1x8x128xf32> to vector<8x128xf32>
    %c1_149 = arith.constant 1 : index
    %c0_150 = arith.constant 0 : index
    %c12_151 = arith.constant 12 : index
    %133 = vector.load %arg10[%c1_149, %c0_150, %c12_151] : memref<2x8x142xf32, #tpu.memory_space<vmem>>, vector<1x8x128xf32>
    %134 = vector.shape_cast %133 : vector<1x8x128xf32> to vector<8x128xf32>
    %c1_152 = arith.constant 1 : index
    %c0_153 = arith.constant 0 : index
    %c13_154 = arith.constant 13 : index
    %135 = vector.load %arg10[%c1_152, %c0_153, %c13_154] : memref<2x8x142xf32, #tpu.memory_space<vmem>>, vector<1x8x128xf32>
    %136 = vector.shape_cast %135 : vector<1x8x128xf32> to vector<8x128xf32>
    %c1_155 = arith.constant 1 : index
    %c0_156 = arith.constant 0 : index
    %c14_157 = arith.constant 14 : index
    %137 = vector.load %arg10[%c1_155, %c0_156, %c14_157] : memref<2x8x142xf32, #tpu.memory_space<vmem>>, vector<1x8x128xf32>
    %138 = vector.shape_cast %137 : vector<1x8x128xf32> to vector<8x128xf32>
    %139 = tpu.concatenate %110, %112, %114, %116, %118, %120, %122, %124, %126, %128, %130, %132, %134, %136, %138 in 0 : vector<8x128xf32>, vector<8x128xf32>, vector<8x128xf32>, vector<8x128xf32>, vector<8x128xf32>, vector<8x128xf32>, vector<8x128xf32>, vector<8x128xf32>, vector<8x128xf32>, vector<8x128xf32>, vector<8x128xf32>, vector<8x128xf32>, vector<8x128xf32>, vector<8x128xf32>, vector<8x128xf32> -> vector<120x128xf32>
    %140 = arith.truncf %139 : vector<120x128xf32> to vector<120x128xbf16>
    %cst_158 = arith.constant dense<0.000000e+00> : vector<8x128xf32>
    %141 = tpu.matmul %1, %140, %cst_158 {dimension_numbers = #tpu.dot_dimension_numbers<[1], [0], [0], [1], [0, 0, 1, 1], [], []>} : vector<8x120xbf16>, vector<120x128xbf16>, vector<8x128xf32> -> vector<8x128xf32>
    %142 = arith.addf %141, %8 : vector<8x128xf32>
    %cst_159 = arith.constant 0.000000e+00 : f32
    %143 = vector.broadcast %cst_159 : f32 to vector<8x128xf32>
    %144 = arith.maximumf %142, %143 : vector<8x128xf32>
    %c1_160 = arith.constant 1 : index
    %c0_161 = arith.constant 0 : index
    %c0_162 = arith.constant 0 : index
    %145 = vector.load %arg1[%c1_160, %c0_161, %c0_162] : memref<2x8x135xf32, #tpu.memory_space<vmem>>, vector<1x8x128xf32>
    %146 = vector.shape_cast %145 : vector<1x8x128xf32> to vector<8x128xf32>
    %c1_163 = arith.constant 1 : index
    %c0_164 = arith.constant 0 : index
    %c0_165 = arith.constant 0 : index
    %147 = vector.load %arg2[%c1_163, %c0_164, %c0_165] : memref<2x8x135xf32, #tpu.memory_space<vmem>>, vector<1x8x128xf32>
    %148 = vector.shape_cast %147 : vector<1x8x128xf32> to vector<8x128xf32>
    %c1_166 = arith.constant 1 : index
    %c0_167 = arith.constant 0 : index
    %c1_168 = arith.constant 1 : index
    %149 = vector.load %arg1[%c1_166, %c0_167, %c1_168] : memref<2x8x135xf32, #tpu.memory_space<vmem>>, vector<1x8x128xf32>
    %150 = vector.shape_cast %149 : vector<1x8x128xf32> to vector<8x128xf32>
    %c1_169 = arith.constant 1 : index
    %c0_170 = arith.constant 0 : index
    %c1_171 = arith.constant 1 : index
    %151 = vector.load %arg2[%c1_169, %c0_170, %c1_171] : memref<2x8x135xf32, #tpu.memory_space<vmem>>, vector<1x8x128xf32>
    %152 = vector.shape_cast %151 : vector<1x8x128xf32> to vector<8x128xf32>
    %c1_172 = arith.constant 1 : index
    %c0_173 = arith.constant 0 : index
    %c2_174 = arith.constant 2 : index
    %153 = vector.load %arg1[%c1_172, %c0_173, %c2_174] : memref<2x8x135xf32, #tpu.memory_space<vmem>>, vector<1x8x128xf32>
    %154 = vector.shape_cast %153 : vector<1x8x128xf32> to vector<8x128xf32>
    %c1_175 = arith.constant 1 : index
    %c0_176 = arith.constant 0 : index
    %c2_177 = arith.constant 2 : index
    %155 = vector.load %arg2[%c1_175, %c0_176, %c2_177] : memref<2x8x135xf32, #tpu.memory_space<vmem>>, vector<1x8x128xf32>
    %156 = vector.shape_cast %155 : vector<1x8x128xf32> to vector<8x128xf32>
    %c1_178 = arith.constant 1 : index
    %c0_179 = arith.constant 0 : index
    %c3_180 = arith.constant 3 : index
    %157 = vector.load %arg1[%c1_178, %c0_179, %c3_180] : memref<2x8x135xf32, #tpu.memory_space<vmem>>, vector<1x8x128xf32>
    %158 = vector.shape_cast %157 : vector<1x8x128xf32> to vector<8x128xf32>
    %c1_181 = arith.constant 1 : index
    %c0_182 = arith.constant 0 : index
    %c3_183 = arith.constant 3 : index
    %159 = vector.load %arg2[%c1_181, %c0_182, %c3_183] : memref<2x8x135xf32, #tpu.memory_space<vmem>>, vector<1x8x128xf32>
    %160 = vector.shape_cast %159 : vector<1x8x128xf32> to vector<8x128xf32>
    %c1_184 = arith.constant 1 : index
    %c0_185 = arith.constant 0 : index
    %c4_186 = arith.constant 4 : index
    %161 = vector.load %arg1[%c1_184, %c0_185, %c4_186] : memref<2x8x135xf32, #tpu.memory_space<vmem>>, vector<1x8x128xf32>
    %162 = vector.shape_cast %161 : vector<1x8x128xf32> to vector<8x128xf32>
    %c1_187 = arith.constant 1 : index
    %c0_188 = arith.constant 0 : index
    %c4_189 = arith.constant 4 : index
    %163 = vector.load %arg2[%c1_187, %c0_188, %c4_189] : memref<2x8x135xf32, #tpu.memory_space<vmem>>, vector<1x8x128xf32>
    %164 = vector.shape_cast %163 : vector<1x8x128xf32> to vector<8x128xf32>
    %c1_190 = arith.constant 1 : index
    %c0_191 = arith.constant 0 : index
    %c5_192 = arith.constant 5 : index
    %165 = vector.load %arg1[%c1_190, %c0_191, %c5_192] : memref<2x8x135xf32, #tpu.memory_space<vmem>>, vector<1x8x128xf32>
    %166 = vector.shape_cast %165 : vector<1x8x128xf32> to vector<8x128xf32>
    %c1_193 = arith.constant 1 : index
    %c0_194 = arith.constant 0 : index
    %c5_195 = arith.constant 5 : index
    %167 = vector.load %arg2[%c1_193, %c0_194, %c5_195] : memref<2x8x135xf32, #tpu.memory_space<vmem>>, vector<1x8x128xf32>
    %168 = vector.shape_cast %167 : vector<1x8x128xf32> to vector<8x128xf32>
    %c1_196 = arith.constant 1 : index
    %c0_197 = arith.constant 0 : index
    %c6_198 = arith.constant 6 : index
    %169 = vector.load %arg1[%c1_196, %c0_197, %c6_198] : memref<2x8x135xf32, #tpu.memory_space<vmem>>, vector<1x8x128xf32>
    %170 = vector.shape_cast %169 : vector<1x8x128xf32> to vector<8x128xf32>
    %c1_199 = arith.constant 1 : index
    %c0_200 = arith.constant 0 : index
    %c6_201 = arith.constant 6 : index
    %171 = vector.load %arg2[%c1_199, %c0_200, %c6_201] : memref<2x8x135xf32, #tpu.memory_space<vmem>>, vector<1x8x128xf32>
    %172 = vector.shape_cast %171 : vector<1x8x128xf32> to vector<8x128xf32>
    %c1_202 = arith.constant 1 : index
    %c0_203 = arith.constant 0 : index
    %c7_204 = arith.constant 7 : index
    %173 = vector.load %arg1[%c1_202, %c0_203, %c7_204] : memref<2x8x135xf32, #tpu.memory_space<vmem>>, vector<1x8x128xf32>
    %174 = vector.shape_cast %173 : vector<1x8x128xf32> to vector<8x128xf32>
    %175 = tpu.concatenate %144, %146, %148, %150, %152, %154, %156, %158, %160, %162, %164, %166, %168, %170, %172, %174 in 0 : vector<8x128xf32>, vector<8x128xf32>, vector<8x128xf32>, vector<8x128xf32>, vector<8x128xf32>, vector<8x128xf32>, vector<8x128xf32>, vector<8x128xf32>, vector<8x128xf32>, vector<8x128xf32>, vector<8x128xf32>, vector<8x128xf32>, vector<8x128xf32>, vector<8x128xf32>, vector<8x128xf32>, vector<8x128xf32> -> vector<128x128xf32>
    %176 = arith.truncf %175 : vector<128x128xf32> to vector<128x128xbf16>
    %cst_205 = arith.constant dense<0.000000e+00> : vector<16x128xf32>
    %177 = tpu.matmul %2, %176, %cst_205 {dimension_numbers = #tpu.dot_dimension_numbers<[1], [0], [0], [1], [0, 0, 1, 1], [], []>} : vector<16x128xbf16>, vector<128x128xbf16>, vector<16x128xf32> -> vector<16x128xf32>
    %178 = arith.addf %177, %11 : vector<16x128xf32>
    %cst_206 = arith.constant 0.000000e+00 : f32
    %179 = vector.broadcast %cst_206 : f32 to vector<16x128xf32>
    %180 = arith.maximumf %178, %179 : vector<16x128xf32>
    %c1_207 = arith.constant 1 : index
    %c0_208 = arith.constant 0 : index
    %c0_209 = arith.constant 0 : index
    %181 = vector.load %arg9[%c1_207, %c0_208, %c0_209] : memref<2x16x128xf32, #tpu.memory_space<vmem>>, vector<1x16x128xf32>
    %182 = vector.shape_cast %181 : vector<1x16x128xf32> to vector<16x128xf32>
    %183 = vector.shape_cast %180 : vector<16x128xf32> to vector<1x16x128xf32>
    tpu.vector_store %arg9[%c1_207, %c0_208, %c0_209], %183 {strides = array<i32>} : memref<2x16x128xf32, #tpu.memory_space<vmem>>, vector<1x16x128xf32>,
    return
  }
  func.func @transform_0(%arg0: i32) -> (i32, i32, i32) {
    %c0_i32 = arith.constant 0 : i32
    %c0_i32_0 = arith.constant 0 : i32
    %c0_i32_1 = arith.constant 0 : i32
    return %arg0, %c0_i32, %c0_i32_0 : i32, i32, i32
  }
  func.func @transform_1(%arg0: i32) -> (i32, i32, i32) {
    %c0_i32 = arith.constant 0 : i32
    %c0_i32_0 = arith.constant 0 : i32
    %c0_i32_1 = arith.constant 0 : i32
    return %arg0, %c0_i32, %c0_i32_0 : i32, i32, i32
  }
  func.func @transform_2(%arg0: i32) -> (i32, i32) {
    %c0_i32 = arith.constant 0 : i32
    %c0_i32_0 = arith.constant 0 : i32
    %c0_i32_1 = arith.constant 0 : i32
    return %c0_i32, %c0_i32_0 : i32, i32
  }
  func.func @transform_3(%arg0: i32) -> (i32, i32) {
    %c0_i32 = arith.constant 0 : i32
    %c0_i32_0 = arith.constant 0 : i32
    %c0_i32_1 = arith.constant 0 : i32
    return %c0_i32, %c0_i32_0 : i32, i32
  }
  func.func @transform_4(%arg0: i32) -> (i32, i32) {
    %c0_i32 = arith.constant 0 : i32
    %c0_i32_0 = arith.constant 0 : i32
    %c0_i32_1 = arith.constant 0 : i32
    return %c0_i32, %c0_i32_0 : i32, i32
  }
  func.func @transform_5(%arg0: i32) -> (i32, i32) {
    %c0_i32 = arith.constant 0 : i32
    %c0_i32_0 = arith.constant 0 : i32
    %c0_i32_1 = arith.constant 0 : i32
    return %c0_i32, %c0_i32_0 : i32, i32
  }
  func.func @transform_6(%arg0: i32) -> (i32, i32) {
    %c0_i32 = arith.constant 0 : i32
    %c0_i32_0 = arith.constant 0 : i32
    %c0_i32_1 = arith.constant 0 : i32
    return %c0_i32, %c0_i32_0 : i32, i32
  }
  func.func @transform_7(%arg0: i32) -> (i32, i32) {
    %c0_i32 = arith.constant 0 : i32
    %c0_i32_0 = arith.constant 0 : i32
    %c0_i32_1 = arith.constant 0 : i32
    return %c0_i32, %c0_i32_0 : i32, i32
  }
  func.func @transform_8(%arg0: i32) -> (i32, i32, i32) {
    %c0_i32 = arith.constant 0 : i32
    %c0_i32_0 = arith.constant 0 : i32
    %c0_i32_1 = arith.constant 0 : i32
    return %arg0, %c0_i32, %c0_i32_0 : i32, i32, i32
  }
}

</mosaic_0001>

<bundles_post_ra>
// kernel: tpu_custom_call.1
= control target key start
LH: loop header
LB: loop body
LE: loop exit
PB: predicated region body
PF: predicated region fallthrough
CT: control target
= control target key end

     0   :  { %13 = vsyncpa [#allocation4], 0  ;;  %s1993_s0 = inlined_call_operand.hbm [shape: f32[2,8,135], index: 0, kind: input, shape index: {}]   ;;  %s1994_s1 = inlined_call_operand.hbm [shape: f32[2,8,135], index: 1, kind: input, shape index: {}]   ;;  %s1995_s2 = inlined_call_operand.hbm [shape: bf16[8,8], index: 2, kind: input, shape index: {}]   ;;  %s1996_s3 = inlined_call_operand.hbm [shape: f32[8,1], index: 3, kind: input, shape index: {}]   ;;  %s1997_s4 = inlined_call_operand.hbm [shape: bf16[8,120], index: 4, kind: input, shape index: {}]   ;;  %s1998_s5 = inlined_call_operand.hbm [shape: f32[8,1], index: 5, kind: input, shape index: {}]   ;;  %s1999_s6 = inlined_call_operand.hbm [shape: bf16[16,128], index: 6, kind: input, shape index: {}]   ;;  %s2000_s7 = inlined_call_operand.hbm [shape: f32[16,1], index: 7, kind: input, shape index: {}]   ;;  %s2001_s8 = inlined_call_operand.hbm [shape: f32[2,16,128], index: 8, kind: output, shape index: {}]  }
   0x1   :  { %14 = vsyncpa [#allocation7], 0 }
   0x2   :  { %15 = vsyncpa [#allocation10], 0 }
   0x3   :  { %16 = vsyncpa [#allocation13], 0 }
   0x4   :  { %17 = vsyncpa [#allocation16], 0 }
   0x5   :  { %18 = vsyncpa [#allocation5], 0  ;;  %s1538_s27 = smov [#allocation6]   ;;  %s1539_s29 = smov [#allocation9]  }
   0x6   :  { %s36_s28 = sshll.u32 %s1538_s27, 4  ;;  %s59_s30 = sshll.u32 %s1539_s29, 4  ;;  %s37_s28 = int_to_ptr.vmem [resolvable:$true] %s36_s28  ;;  %s60_s30 = int_to_ptr.vmem [resolvable:$true] %s59_s30 }
   0x7   :  { %s1328_s11 = scalar_lea.hbm %s1994_s1, 512 }
   0x8   :  { %p1329_p0 = scmp.ne.s32.totalorder %s1994_s1, %s1328_s11  ;;  %p1332_p1 = scmp.lt.u32.totalorder %s1328_s11, %s1994_s1 }
   0xa   :  { %p1334_p2 = pnand %p1332_p1, %p1329_p0 }
   0xc   :  { %1337 = shalt.err (!%p1334_p2)
}
   0xd   :  { %s1338_s16 = scalar_lea.vmem %s37_s28, 512  ;;  %p1343_p4 = scmp.lt.s32.totalorder %s37_s28, %s37_s28 }
   0xe   :  { %p1339_p3 = scmp.ne.s32.totalorder %s37_s28, %s1338_s16  ;;  %p1344_p5 = scmp.lt.s32.totalorder %s1338_s16, %s1338_s16 }
  0x10   :  { %p1345_p6 = por %p1344_p5, %p1343_p4 }
  0x12   :  { %p1346_p7 = pnand %p1345_p6, %p1339_p3 }
  0x14   :  { %1349 = shalt.err (!%p1346_p7)
}
  0x15   :  { %s1540_s17 = smov 256   ;;  %s1541_s18 = smov 16  }
  0x16   :  { %42 = dma.hbm_to_vmem [thread:$0]  %s1994_s1, 512, %s37_s28, [#allocation7], %s1540_s17, %s1540_s17, %s1541_s18  }
  0x17   :  { %s1350_s23 = scalar_lea.hbm %s1996_s3, 128 }
  0x18   :  { %p1351_p8 = scmp.ne.s32.totalorder %s1996_s3, %s1350_s23  ;;  %p1354_p9 = scmp.lt.u32.totalorder %s1350_s23, %s1996_s3 }
  0x1a   :  { %p1356_p10 = pnand %p1354_p9, %p1351_p8 }
  0x1c   :  { %1359 = shalt.err (!%p1356_p10)
}
  0x1d   :  { %s1360_s29 = scalar_lea.vmem %s60_s30, 128  ;;  %p1365_p12 = scmp.lt.s32.totalorder %s60_s30, %s60_s30 }
  0x1e   :  { %p1361_p11 = scmp.ne.s32.totalorder %s60_s30, %s1360_s29  ;;  %p1366_p13 = scmp.lt.s32.totalorder %s1360_s29, %s1360_s29 }
  0x20   :  { %p1367_p0 = por %p1366_p13, %p1365_p12 }
  0x22   :  { %p1368_p1 = pnand %p1367_p0, %p1361_p11 }
  0x24   :  { %1371 = shalt.err (!%p1368_p1)
}
  0x25   :  { %62 = dma.hbm_to_vmem [thread:$0]  %s1996_s3, 128, %s60_s30, [#allocation10]  }
  0x26   :  { %s1542_s9 = smov [#allocation12]   ;;  %s1543_s11 = smov [#allocation3]  }
  0x27   :  { %s79_s10 = sshll.u32 %s1542_s9, 4  ;;  %s24_s12 = sshll.u32 %s1543_s11, 4  ;;  %s80_s10 = int_to_ptr.vmem [resolvable:$true] %s79_s10  ;;  %s1643_s12 = int_to_ptr.vmem [resolvable:$true] %s24_s12 }
  0x28   :  { %s1372_s15 = scalar_lea.hbm %s1998_s5, 128 }
  0x29   :  { %p1373_p2 = scmp.ne.s32.totalorder %s1998_s5, %s1372_s15  ;;  %p1376_p3 = scmp.lt.u32.totalorder %s1372_s15, %s1998_s5 }
  0x2b   :  { %p1378_p4 = pnand %p1376_p3, %p1373_p2 }
  0x2d   :  { %1381 = shalt.err (!%p1378_p4)
}
  0x2e   :  { %s1382_s3 = scalar_lea.vmem %s80_s10, 128  ;;  %p1387_p6 = scmp.lt.s32.totalorder %s80_s10, %s80_s10 }
  0x2f   :  { %p1383_p5 = scmp.ne.s32.totalorder %s80_s10, %s1382_s3  ;;  %p1388_p7 = scmp.lt.s32.totalorder %s1382_s3, %s1382_s3 }
  0x31   :  { %p1389_p8 = por %p1388_p7, %p1387_p6 }
  0x33   :  { %p1390_p9 = pnand %p1389_p8, %p1383_p5 }
  0x35   :  { %1393 = shalt.err (!%p1390_p9)
}
  0x36   :  { %82 = dma.hbm_to_vmem [thread:$0]  %s1998_s5, 128, %s80_s10, [#allocation13]  }
  0x37   :  { %s1394_s25 = scalar_lea.hbm %s1993_s0, 512 }
  0x38   :  { %p1395_p10 = scmp.ne.s32.totalorder %s1993_s0, %s1394_s25  ;;  %p1398_p11 = scmp.lt.u32.totalorder %s1394_s25, %s1993_s0 }
  0x3a   :  { %p1400_p12 = pnand %p1398_p11, %p1395_p10 }
  0x3c   :  { %1403 = shalt.err (!%p1400_p12)
}
  0x3d   :  { %s1404_s28 = scalar_lea.vmem %s1643_s12, 512  ;;  %p1409_p0 = scmp.lt.s32.totalorder %s1643_s12, %s1643_s12 }
  0x3e   :  { %p1405_p13 = scmp.ne.s32.totalorder %s1643_s12, %s1404_s28  ;;  %p1410_p1 = scmp.lt.s32.totalorder %s1404_s28, %s1404_s28 }
  0x40   :  { %p1411_p2 = por %p1410_p1, %p1409_p0 }
  0x42   :  { %p1412_p3 = pnand %p1411_p2, %p1405_p13 }
  0x44   :  { %1415 = shalt.err (!%p1412_p3)
}
  0x45   :  { %30 = dma.hbm_to_vmem [thread:$0]  %s1993_s0, 512, %s1643_s12, [#allocation4], %s1540_s17, %s1540_s17, %s1541_s18  }
  0x46   :  { %s1544_s10 = smov [#allocation8]   ;;  %s1545_s13 = smov [#allocation11]  }
  0x47   :  { %s49_s11 = sshll.u32 %s1544_s10, 4  ;;  %s69_s14 = sshll.u32 %s1545_s13, 4  ;;  %s50_s11 = int_to_ptr.vmem [resolvable:$true] %s49_s11  ;;  %s70_s14 = int_to_ptr.vmem [resolvable:$true] %s69_s14 }
  0x48   :  { %s1416_s19 = scalar_lea.hbm %s1995_s2, 64 }
  0x49   :  { %p1417_p4 = scmp.ne.s32.totalorder %s1995_s2, %s1416_s19  ;;  %p1420_p5 = scmp.lt.u32.totalorder %s1416_s19, %s1995_s2 }
  0x4b   :  { %p1422_p6 = pnand %p1420_p5, %p1417_p4 }
  0x4d   :  { %1425 = shalt.err (!%p1422_p6)
}
  0x4e   :  { %s1426_s0 = scalar_lea.vmem %s50_s11, 64  ;;  %p1431_p8 = scmp.lt.s32.totalorder %s50_s11, %s50_s11 }
  0x4f   :  { %p1427_p7 = scmp.ne.s32.totalorder %s50_s11, %s1426_s0  ;;  %p1432_p9 = scmp.lt.s32.totalorder %s1426_s0, %s1426_s0 }
  0x51   :  { %p1433_p10 = por %p1432_p9, %p1431_p8 }
  0x53   :  { %p1434_p11 = pnand %p1433_p10, %p1427_p7 }
  0x55   :  { %1437 = shalt.err (!%p1434_p11)
}
  0x56   :  { %52 = dma.hbm_to_vmem [thread:$0]  %s1995_s2, 64, %s50_s11, [#allocation7]  }
  0x57   :  { %s1438_s23 = scalar_lea.hbm %s1997_s4, 64 }
  0x58   :  { %p1439_p12 = scmp.ne.s32.totalorder %s1997_s4, %s1438_s23  ;;  %p1442_p13 = scmp.lt.u32.totalorder %s1438_s23, %s1997_s4 }
  0x5a   :  { %p1444_p0 = pnand %p1442_p13, %p1439_p12 }
  0x5c   :  { %1447 = shalt.err (!%p1444_p0)
}
  0x5d   :  { %s1448_s29 = scalar_lea.vmem %s70_s14, 64  ;;  %p1453_p2 = scmp.lt.s32.totalorder %s70_s14, %s70_s14 }
  0x5e   :  { %p1449_p1 = scmp.ne.s32.totalorder %s70_s14, %s1448_s29  ;;  %p1454_p3 = scmp.lt.s32.totalorder %s1448_s29, %s1448_s29 }
  0x60   :  { %p1455_p4 = por %p1454_p3, %p1453_p2 }
  0x62   :  { %p1456_p5 = pnand %p1455_p4, %p1449_p1 }
  0x64   :  { %1459 = shalt.err (!%p1456_p5)
}
  0x65   :  { %72 = dma.hbm_to_vmem [thread:$0]  %s1997_s4, 64, %s70_s14, [#allocation10]  }
  0x66   :  { %s1546_s28 = smov [#allocation14]   ;;  %s1460_s11 = scalar_lea.hbm %s1999_s6, 128 }
  0x67   :  { %s88_s5 = sshll.u32 %s1546_s28, 4  ;;  %p1461_p6 = scmp.ne.s32.totalorder %s1999_s6, %s1460_s11  ;;  %s89_s5 = int_to_ptr.vmem [resolvable:$true] %s88_s5 }
  0x68   :  { %p1464_p7 = scmp.lt.u32.totalorder %s1460_s11, %s1999_s6 }
  0x6a   :  { %p1466_p8 = pnand %p1464_p7, %p1461_p6 }
  0x6c   :  { %1469 = shalt.err (!%p1466_p8)
}
  0x6d   :  { %s1470_s20 = scalar_lea.vmem %s89_s5, 128  ;;  %p1475_p10 = scmp.lt.s32.totalorder %s89_s5, %s89_s5 }
  0x6e   :  { %p1471_p9 = scmp.ne.s32.totalorder %s89_s5, %s1470_s20  ;;  %p1476_p11 = scmp.lt.s32.totalorder %s1470_s20, %s1470_s20 }
  0x70   :  { %p1477_p12 = por %p1476_p11, %p1475_p10 }
  0x72   :  { %p1478_p13 = pnand %p1477_p12, %p1471_p9 }
  0x74   :  { %1481 = shalt.err (!%p1478_p13)
}
  0x75   :  { %s1547_s4 = smov 64   ;;  %s1548_s14 = smov 4  }
  0x76   :  { %94 = dma.hbm_to_vmem [thread:$0]  %s1999_s6, 128, %s89_s5, [#allocation13], %s1547_s4, %s1547_s4, %s1548_s14  }
  0x77   :  { %s1549_s30 = smov [#allocation15]   ;;  %s1482_s12 = scalar_lea.hbm %s2000_s7, 256 }
  0x78   :  { %s100_s0 = sshll.u32 %s1549_s30, 4  ;;  %p1483_p0 = scmp.ne.s32.totalorder %s2000_s7, %s1482_s12  ;;  %s101_s0 = int_to_ptr.vmem [resolvable:$true] %s100_s0 }
  0x79   :  { %p1486_p1 = scmp.lt.u32.totalorder %s1482_s12, %s2000_s7 }
  0x7b   :  { %p1488_p2 = pnand %p1486_p1, %p1483_p0 }
  0x7d   :  { %1491 = shalt.err (!%p1488_p2)
}
  0x7e   :  { %s1492_s26 = scalar_lea.vmem %s101_s0, 256  ;;  %p1497_p4 = scmp.lt.s32.totalorder %s101_s0, %s101_s0 }
  0x7f   :  { %p1493_p3 = scmp.ne.s32.totalorder %s101_s0, %s1492_s26  ;;  %p1498_p5 = scmp.lt.s32.totalorder %s1492_s26, %s1492_s26 }
  0x81   :  { %p1499_p6 = por %p1498_p5, %p1497_p4 }
  0x83   :  { %p1500_p7 = pnand %p1499_p6, %p1493_p3 }
  0x85   :  { %1503 = shalt.err (!%p1500_p7)
}
  0x86   :  { %s1550_s6 = smov 128   ;;  %s1551_s27 = smov 8  }
  0x87   :  { %106 = dma.hbm_to_vmem [thread:$0]  %s2000_s7, 256, %s101_s0, [#allocation16], %s1550_s6, %s1550_s6, %s1551_s27  }
  0x88   :  { %1526 = dma.done.wait [#allocation4], 512  }
  0x89   :  { %1527 = vsyncadd [#allocation4], 4294966784 }
  0x8a   :  { %1528 = dma.done.wait [#allocation7], 576  }
  0x8b   :  { %1529 = vsyncadd [#allocation7], 4294966720 }
  0x8c   :  { %1530 = dma.done.wait [#allocation10], 192  }
  0x8d   :  { %1531 = vsyncadd [#allocation10], 4294967104 }
  0x8e   :  { %1532 = dma.done.wait [#allocation13], 256  }
  0x8f   :  { %1533 = vsyncadd [#allocation13], 4294967040 }
  0x90   :  { %1534 = dma.done.wait [#allocation16], 256  }
  0x91   :  { %1535 = vsyncadd [#allocation16], 4294967040  ;;  %v1552_v0 = vmov 0.0   ;;  %vm1553_vm0 = vmmov 0   ;;  %v1554_v1 = vmov 0   ;;  %v1736_v2 = vld [vmem:[#allocation3] sm:$0xff] }
  0x92   :  { %930 = vmatprep.subr.bf16.mxu0 %v1552_v0  ;;  %160 = vst [vmem:[#allocation2] sm:$0xff] %v1552_v0  ;;  %163 = vst [vmem:[#allocation2 + $0x10] sm:$0xff] %v1552_v0  ;;  %932 = vmatprep.mubr.msk.bf16.mxu0 %vm1553_vm0, %v1552_v0  ;;  %v166_v3 = vpack.c.bf16 %v1736_v2, %v1736_v2  ;;  %s1555_s7 = smov 122   ;;  %v136_v4 = vld [vmem:[#allocation9] sm:$0xff]  ;;  %vm174_vm1 = vcmask 1043456   ;;  %vm170_vm2 = vcmask 64512  }
  0x93   :  { %1055 = vset.pattern.permute.xlu0 %v1554_v1  ;;  %936 = vmatprep.subr.bf16.mxu1 %v1552_v0  ;;  %v1742_v7 = vld [vmem:[#allocation8] sm:$0xf]  ;;  %vm161_vm3 = vcmask 113664   ;;  %s1556_s1 = smov 12   ;;  %vm223_vm4 = vcmask 162912   ;;  %s1557_s28 = smov 125  }
  0x94   :  { %952 = vmatprep.mubr.msk.bf16.mxu1 %vm1553_vm0, %v1552_v0  ;;  %1326 = vset.pattern.permute.xlu1 %v1554_v1  ;;  %162 = vst.msk [vmem:[#allocation2 + $0x8] sm:$0xff] %vm161_vm3, %v1552_v0  ;;  %164 = vst.msk [vmem:[#allocation2 + $0x18] sm:$0xff] %vm161_vm3, %v1552_v0  ;;  %s1558_s5 = smov 127   ;;  %s1559_s9 = smov 123   ;;  %v1766_v19 = vld [vmem:[#allocation3 + $0x10] sm:$0xff]  ;;  %vm233_vm5 = vcmask 1039360  }
  0x95   :  { %168 = vrot.lane.b32.xlu0 %v166_v3, %s1555_s7  ;;  %s1560_s10 = smov 126   ;;  %s1561_s11 = smov 121   ;;  %v529_v20 = vpack.c.bf16 %v1766_v19, %v1766_v19  ;;  %v142_v21 = vld [vmem:[#allocation12] sm:$0xff]  ;;  %vm240_vm6 = vcmask 1031168   ;;  %vm247_vm7 = vcmask 1022976   ;;  %vm254_vm8 = vcmask 1014784  }
  0x96   :  { %s1562_s13 = smov 124   ;;  %s1563_s15 = smov 119   ;;  %vm261_vm9 = vcmask 1006592   ;;  %vm268_vm10 = vcmask 998400   ;;  %vm2003_vm11 = vcmask 990208   ;;  %vm282_vm12 = vcmask 982016  }
  0x97   :  { %s1564_s16 = smov 117   ;;  %s1565_s19 = smov 120   ;;  %vm2002_vm13 = vcmask 973824   ;;  %vm296_vm14 = vcmask 965632   ;;  %vm303_vm15 = vcmask 957440   ;;  %vm310_vm3 = vcmask 949248  }
  0x98   :  { %s1566_s20 = smov 115   ;;  %s1567_s4 = smov 118  }
  0x99   :  { %139 = vperm.xlu0 %1055, %v136_v4   ;;  %s1568_s14 = smov 116   ;;  %s1569_s21 = smov 114  }
  0x9a   :  { %s1570_s3 = smov [#allocation17]  }
  0x9b   :  { %v226_v16 = vld [vmem:[#allocation2 + $0x8] sm:$0xff]  ;;  %s869_s30 = sshll.u32 %s1570_s3, 4  ;;  %s870_s30 = int_to_ptr.vmem [resolvable:$true] %s869_s30 }
  0x9c   :  { %s1504_s0 = scalar_lea.vmem %s870_s30, 512  ;;  %p1509_p9 = scmp.lt.s32.totalorder %s870_s30, %s870_s30 }
  0x9d   :  { %p1505_p8 = scmp.ne.s32.totalorder %s870_s30, %s1504_s0  ;;  %p1510_p10 = scmp.lt.s32.totalorder %s1504_s0, %s1504_s0 }
  0x9f   :  { %p1511_p11 = por %p1510_p10, %p1509_p9 }
  0xa1   :  { %p1512_p12 = pnand %p1511_p11, %p1505_p8 }
 0x107   :  { %v169_v5 = vpop.permute.xlu0 %168 }
 0x108   :  { %v176_v6 = vsel %vm174_vm1, %v169_v5, 0 }
 0x109   :  { %931 = vmatpush3.bf16.msra.mxu0 %v176_v6 }
 0x10a   :  { %956 = vmatprep.subr.bf16.mxu0 %v1552_v0 }
 0x10c   :  { %933 = vmatmul.mubr.msk.bf16.vlgmr.msra.gmra.mrb[0].mxu0 %vm170_vm2, %v1742_v7 }
 0x10d   :  { %972 = vmatprep.mubr.msk.bf16.mxu0 %vm1553_vm0, %v1552_v0 }
 0x118   :  { %v1751_v8 = vpop.permute.xlu0 %139 }
 0x1df   :  { %v212_v9 = vpop.f32.mrb[0].mxu0 }
 0x1e0   :  { %v213_v10 = vadd.f32 %v212_v9, %v1751_v8  ;;  %v934_v11 = vpop.f32.mrb[1].mxu0 }
 0x1e1   :  { %v215_v12 = vpop.f32.mrb[2].mxu0 }
 0x1e2   :  { %v218_v13 = vmax.f32 %v213_v10, 0.0  ;;  %v935_v14 = vpop.f32.mrb[3].mxu0 }
 0x1e4   :  { %220 = vrot.lane.b32.xlu1 %v218_v13, %s1556_s1 }
 0x256   :  { %v221_v15 = vpop.permute.xlu1 %220 }
 0x257   :  { %224 = vst.msk [vmem:[#allocation2] sm:$0xff] %vm223_vm4, %v221_v15 }
 0x25e   :  { %v225_v17 = vld [vmem:[#allocation2] sm:$0xff] }
 0x25f   :  { %v1066_v18 = vpack.i.bf16 %v226_v16, %v225_v17 }
 0x261   :  { %1067 = vrot.lane.b32.xlu0 %v1066_v18, %s1557_s28  ;;  %1057 = vrot.lane.b32.xlu1 %v1066_v18, %s1558_s5 }
 0x265   :  { %1077 = vrot.lane.b32.xlu0 %v1066_v18, %s1559_s9  ;;  %1062 = vrot.lane.b32.xlu1 %v1066_v18, %s1560_s10 }
 0x269   :  { %1087 = vrot.lane.b32.xlu0 %v1066_v18, %s1561_s11  ;;  %1072 = vrot.lane.b32.xlu1 %v1066_v18, %s1562_s13 }
 0x26d   :  { %1097 = vrot.lane.b32.xlu0 %v1066_v18, %s1563_s15  ;;  %1082 = vrot.lane.b32.xlu1 %v1066_v18, %s1555_s7 }
 0x271   :  { %1107 = vrot.lane.b32.xlu0 %v1066_v18, %s1564_s16  ;;  %1092 = vrot.lane.b32.xlu1 %v1066_v18, %s1565_s19 }
 0x275   :  { %1117 = vrot.lane.b32.xlu0 %v1066_v18, %s1566_s20  ;;  %1102 = vrot.lane.b32.xlu1 %v1066_v18, %s1567_s4 }
 0x279   :  { %531 = vrot.lane.b32.xlu0 %v529_v20, %s1555_s7  ;;  %1112 = vrot.lane.b32.xlu1 %v1066_v18, %s1568_s14 }
 0x27d   :  { %145 = vperm.xlu0 %1055, %v142_v21   ;;  %1122 = vrot.lane.b32.xlu1 %v1066_v18, %s1569_s21 }
 0x2d3   :  { %v1068_v22 = vpop.permute.xlu0 %1067  ;;  %v1058_v23 = vpop.permute.xlu1 %1057 }
 0x2d4   :  { %v1060_v24 = vunpack.i.h.bf16 %v1058_v23  ;;  %v1059_v25 = vunpack.i.l.bf16 %v1058_v23  ;;  %v1070_v26 = vunpack.i.h.bf16 %v1068_v22  ;;  %v1069_v27 = vunpack.i.l.bf16 %v1068_v22 }
 0x2d6   :  { %v234_v28 = vsel %vm233_vm5, %v1059_v25, %v1060_v24  ;;  %v248_v37 = vsel %vm247_vm7, %v1069_v27, %v1070_v26 }
 0x2d7   :  { %v1078_v29 = vpop.permute.xlu0 %1077  ;;  %v1063_v30 = vpop.permute.xlu1 %1062  ;;  %v327_v31 = vpack.c.bf16 %v234_v28, %v225_v17 }
 0x2d8   :  { %v1065_v32 = vunpack.i.h.bf16 %v1063_v30  ;;  %v1064_v33 = vunpack.i.l.bf16 %v1063_v30  ;;  %v1080_v34 = vunpack.i.h.bf16 %v1078_v29  ;;  %v1079_v35 = vunpack.i.l.bf16 %v1078_v29  ;;  %v1797_v29 = vld [vmem:[#allocation11] sm:$0xf] }
 0x2d9   :  { %937 = vmatpush3.bf16.msra.mxu1 %v327_v31  ;;  %v383_v31 = vld [vmem:[#allocation6] sm:$0xff] }
 0x2da   :  { %938 = vmatprep.subr.bf16.mxu1 %v1552_v0  ;;  %v241_v36 = vsel %vm240_vm6, %v1064_v33, %v1065_v32  ;;  %v262_v46 = vsel %vm261_vm9, %v1079_v35, %v1080_v34  ;;  %v385_v32 = vld [vmem:[#allocation6 + $0x8] sm:$0xff] }
 0x2db   :  { %v1088_v38 = vpop.permute.xlu0 %1087  ;;  %v1073_v39 = vpop.permute.xlu1 %1072  ;;  %v328_v40 = vpack.c.bf16 %v248_v37, %v241_v36  ;;  %v1131_v33 = vpack.i.bf16 %v385_v32, %v383_v31 }
 0x2dc   :  { %v1075_v41 = vunpack.i.h.bf16 %v1073_v39  ;;  %v1074_v42 = vunpack.i.l.bf16 %v1073_v39  ;;  %v1090_v43 = vunpack.i.h.bf16 %v1088_v38  ;;  %v1089_v44 = vunpack.i.l.bf16 %v1088_v38 }
 0x2dd   :  { %939 = vmatpush3.bf16.msra.mxu1 %v328_v40  ;;  %1132 = vrot.lane.b32.xlu0 %v1131_v33, %s1558_s5 }
 0x2de   :  { %940 = vmatprep.subr.bf16.mxu1 %v1552_v0  ;;  %v255_v45 = vsel %vm254_vm8, %v1074_v42, %v1075_v41  ;;  %v276_v55 = vsel %vm2003_vm11, %v1089_v44, %v1090_v43  ;;  %vm324_vm11 = vcmask 932864  }
 0x2df   :  { %v1098_v47 = vpop.permute.xlu0 %1097  ;;  %v1083_v48 = vpop.permute.xlu1 %1082  ;;  %v329_v49 = vpack.c.bf16 %v262_v46, %v255_v45  ;;  %v384_v45 = vld [vmem:[#allocation3 + $0x8] sm:$0xff] }
 0x2e0   :  { %v1085_v50 = vunpack.i.h.bf16 %v1083_v48  ;;  %v1084_v51 = vunpack.i.l.bf16 %v1083_v48  ;;  %v1100_v52 = vunpack.i.h.bf16 %v1098_v47  ;;  %v1099_v53 = vunpack.i.l.bf16 %v1098_v47 }
 0x2e1   :  { %941 = vmatpush3.bf16.msra.mxu1 %v329_v49  ;;  %1142 = vrot.lane.b32.xlu0 %v1131_v33, %s1560_s10  ;;  %v1126_v48 = vpack.i.bf16 %v384_v45, %v1736_v2 }
 0x2e2   :  { %942 = vmatprep.subr.bf16.mxu1 %v1552_v0  ;;  %v269_v54 = vsel %vm268_vm10, %v1084_v51, %v1085_v50  ;;  %v290_v1 = vsel %vm2002_vm13, %v1099_v53, %v1100_v52  ;;  %vm317_vm13 = vcmask 941056  }
 0x2e3   :  { %v1108_v56 = vpop.permute.xlu0 %1107  ;;  %v1093_v57 = vpop.permute.xlu1 %1092  ;;  %v330_v58 = vpack.c.bf16 %v276_v55, %v269_v54 }
 0x2e4   :  { %v1095_v59 = vunpack.i.h.bf16 %v1093_v57  ;;  %v1094_v60 = vunpack.i.l.bf16 %v1093_v57  ;;  %v1110_v61 = vunpack.i.h.bf16 %v1108_v56  ;;  %v1109_v62 = vunpack.i.l.bf16 %v1108_v56  ;;  %v584_v56 = vld [vmem:[#allocation2 + $0x18] sm:$0xff] }
 0x2e5   :  { %943 = vmatpush3.bf16.msra.mxu1 %v330_v58  ;;  %1152 = vrot.lane.b32.xlu0 %v1131_v33, %s1557_s28 }
 0x2e6   :  { %944 = vmatprep.subr.bf16.mxu1 %v1552_v0  ;;  %v283_v63 = vsel %vm282_vm12, %v1094_v60, %v1095_v59  ;;  %v304_v13 = vsel %vm303_vm15, %v1109_v62, %v1110_v61 }
 0x2e7   :  { %v1118_v3 = vpop.permute.xlu0 %1117  ;;  %v1103_v4 = vpop.permute.xlu1 %1102  ;;  %v331_v5 = vpack.c.bf16 %v290_v1, %v283_v63 }
 0x2e8   :  { %v1105_v6 = vunpack.i.h.bf16 %v1103_v4  ;;  %v1104_v9 = vunpack.i.l.bf16 %v1103_v4  ;;  %v1120_v10 = vunpack.i.h.bf16 %v1118_v3  ;;  %v1119_v11 = vunpack.i.l.bf16 %v1118_v3 }
 0x2e9   :  { %945 = vmatpush3.bf16.msra.mxu1 %v331_v5  ;;  %1162 = vrot.lane.b32.xlu0 %v1131_v33, %s1562_s13 }
 0x2ea   :  { %946 = vmatprep.subr.bf16.mxu1 %v1552_v0  ;;  %v297_v12 = vsel %vm296_vm14, %v1104_v9, %v1105_v6  ;;  %v318_v20 = vsel %vm317_vm13, %v1119_v11, %v1120_v10 }
 0x2eb   :  { %v1113_v14 = vpop.permute.xlu1 %1112  ;;  %v332_v15 = vpack.c.bf16 %v304_v13, %v297_v12  ;;  %v532_v28 = vpop.permute.xlu0 %531 }
 0x2ec   :  { %v1115_v16 = vunpack.i.h.bf16 %v1113_v14  ;;  %v1114_v17 = vunpack.i.l.bf16 %v1113_v14  ;;  %v534_v30 = vsel %vm174_vm1, %v532_v28, 0 }
 0x2ed   :  { %947 = vmatpush3.bf16.msra.mxu1 %v332_v15  ;;  %1172 = vrot.lane.b32.xlu0 %v1131_v33, %s1559_s9 }
 0x2ee   :  { %948 = vmatprep.subr.bf16.mxu1 %v1552_v0  ;;  %v311_v18 = vsel %vm310_vm3, %v1114_v17, %v1115_v16 }
 0x2ef   :  { %v1123_v21 = vpop.permute.xlu1 %1122  ;;  %v333_v22 = vpack.c.bf16 %v318_v20, %v311_v18 }
 0x2f0   :  { %v1125_v23 = vunpack.i.h.bf16 %v1123_v21  ;;  %v1124_v24 = vunpack.i.l.bf16 %v1123_v21 }
 0x2f1   :  { %949 = vmatpush3.bf16.msra.mxu1 %v333_v22  ;;  %1182 = vrot.lane.b32.xlu0 %v1131_v33, %s1555_s7 }
 0x2f2   :  { %950 = vmatprep.subr.bf16.mxu1 %v1552_v0  ;;  %v325_v25 = vsel %vm324_vm11, %v1124_v24, %v1125_v23 }
 0x2f3   :  { %v334_v26 = vpack.c.bf16 %v325_v25, %v325_v25 }
 0x2f5   :  { %v339_v27 = vsel %vm174_vm1, %v334_v26, 0 }
 0x2f6   :  { %951 = vmatpush3.bf16.msra.mxu1 %v339_v27 }
 0x2f7   :  { %976 = vmatprep.subr.bf16.mxu1 %v1552_v0 }
 0x2f9   :  { %953 = vmatmul.mubr.msk.bf16.vlgmr.msra.gmra.mrb[0].mxu1 %vm282_vm12, %v1797_v29 }
 0x2fa   :  { %977 = vmatpush3.bf16.msra.mxu1 %v534_v30  ;;  %978 = vmatprep.mubr.msk.bf16.mxu1 %vm1553_vm0, %v1552_v0 }
 0x2fb   :  { %1002 = vmatprep.subr.bf16.mxu1 %v1552_v0 }
 0x2fc   :  { %v1816_v34 = vpop.permute.xlu0 %145 }
 0x301   :  { %979 = vmatmul.mubr.msk.bf16.vlgmr.msra.gmra.mrb[4].mxu1 %vm170_vm2, %v1742_v7  ;;  %vm2004_vm2 = vcmask 990208  }
 0x302   :  { %1018 = vmatprep.mubr.msk.bf16.mxu1 %vm1553_vm0, %v1552_v0 }
 0x3cc   :  { %v375_v7 = vpop.f32.mrb[0].mxu1 }
 0x3cd   :  { %v376_v35 = vadd.f32 %v375_v7, %v1816_v34  ;;  %v954_v36 = vpop.f32.mrb[1].mxu1 }
 0x3ce   :  { %v378_v37 = vpop.f32.mrb[2].mxu1 }
 0x3cf   :  { %v381_v38 = vmax.f32 %v376_v35, 0.0  ;;  %v955_v39 = vpop.f32.mrb[3].mxu1 }
 0x3d1   :  { %v468_v40 = vpack.c.bf16 %v1736_v2, %v381_v38 }
 0x3d3   :  { %957 = vmatpush3.bf16.msra.mxu0 %v468_v40 }
 0x3d4   :  { %v570_v41 = vpop.f32.mrb[4].mxu1  ;;  %958 = vmatprep.subr.bf16.mxu0 %v1552_v0 }
 0x3d5   :  { %v571_v42 = vadd.f32 %v570_v41, %v1751_v8  ;;  %v980_v43 = vpop.f32.mrb[5].mxu1  ;;  %v1133_v8 = vpop.permute.xlu0 %1132 }
 0x3d6   :  { %v573_v44 = vpop.f32.mrb[6].mxu1  ;;  %v1135_v52 = vunpack.i.h.bf16 %v1133_v8  ;;  %v1134_v53 = vunpack.i.l.bf16 %v1133_v8 }
 0x3d7   :  { %v576_v46 = vmax.f32 %v571_v42, 0.0  ;;  %v981_v47 = vpop.f32.mrb[7].mxu1 }
 0x3d8   :  { %v400_v60 = vsel %vm233_vm5, %v1134_v53, %v1135_v52  ;;  %v1894_v53 = vld [vmem:[#allocation6 + $0x10] sm:$0xff] }
 0x3d9   :  { %578 = vrot.lane.b32.xlu1 %v576_v46, %s1556_s1  ;;  %v1143_v49 = vpop.permute.xlu0 %1142 }
 0x3da   :  { %v1145_v62 = vunpack.i.h.bf16 %v1143_v49  ;;  %v1144_v63 = vunpack.i.l.bf16 %v1143_v49 }
 0x3dc   :  { %v412_v10 = vsel %vm240_vm6, %v1144_v63, %v1145_v62 }
 0x3dd   :  { %1127 = vrot.lane.b32.xlu1 %v1126_v48, %s1558_s5  ;;  %v1153_v2 = vpop.permute.xlu0 %1152 }
 0x3de   :  { %v1155_v12 = vunpack.i.h.bf16 %v1153_v2  ;;  %v1154_v13 = vunpack.i.l.bf16 %v1153_v2  ;;  %v726_v2 = vld [vmem:[#allocation3 + $0x18] sm:$0xff] }
 0x3df   :  { %v1261_v52 = vpack.i.bf16 %v726_v2, %v1766_v19 }
 0x3e0   :  { %v424_v20 = vsel %vm247_vm7, %v1154_v13, %v1155_v12 }
 0x3e1   :  { %1137 = vrot.lane.b32.xlu1 %v1126_v48, %s1560_s10  ;;  %v1163_v5 = vpop.permute.xlu0 %1162 }
 0x3e2   :  { %v1165_v22 = vunpack.i.h.bf16 %v1163_v5  ;;  %v1164_v23 = vunpack.i.l.bf16 %v1163_v5 }
 0x3e4   :  { %v436_v28 = vsel %vm254_vm8, %v1164_v23, %v1165_v22 }
 0x3e5   :  { %1147 = vrot.lane.b32.xlu1 %v1126_v48, %s1557_s28  ;;  %v1173_v17 = vpop.permute.xlu0 %1172 }
 0x3e6   :  { %v1174_v32 = vunpack.i.l.bf16 %v1173_v17 }
 0x3e9   :  { %1157 = vrot.lane.b32.xlu1 %v1126_v48, %s1562_s13  ;;  %v1183_v35 = vpop.permute.xlu0 %1182 }
 0x3ea   :  { %v1185_v40 = vunpack.i.h.bf16 %v1183_v35  ;;  %v1184_v41 = vunpack.i.l.bf16 %v1183_v35 }
 0x3ec   :  { %v460_v46 = vsel %vm268_vm10, %v1184_v41, %v1185_v40 }
 0x3ed   :  { %1167 = vrot.lane.b32.xlu1 %v1126_v48, %s1559_s9 }
 0x3f1   :  { %1177 = vrot.lane.b32.xlu1 %v1126_v48, %s1555_s7 }
 0x3f5   :  { %1187 = vrot.lane.b32.xlu1 %v1126_v48, %s1561_s11 }
 0x44b   :  { %v579_v50 = vpop.permute.xlu1 %578 }
 0x44c   :  { %582 = vst.msk [vmem:[#allocation2 + $0x10] sm:$0xff] %vm223_vm4, %v579_v50  ;;  %vm2006_vm4 = vcmask 973824  }
 0x44f   :  { %v1128_v51 = vpop.permute.xlu1 %1127 }
 0x450   :  { %v1130_v54 = vunpack.i.h.bf16 %v1128_v51  ;;  %v1129_v55 = vunpack.i.l.bf16 %v1128_v51  ;;  %v1880_v51 = vld [vmem:[#allocation14] sm:$0xff]  }
 0x452   :  { %v392_v57 = vsel %vm233_vm5, %v1129_v55, %v1130_v54  ;;  %v727_v54 = vld [vmem:[#allocation6 + $0x18] sm:$0xff] }
 0x453   :  { %v1833_v58 = vld [vmem:[#allocation2 + $0x10] sm:$0xff]  ;;  %v469_v59 = vpack.c.bf16 %v392_v57, %v383_v31  ;;  %v1138_v61 = vpop.permute.xlu1 %1137  ;;  %v1175_v31 = vunpack.i.h.bf16 %v1173_v17  ;;  %v1266_v55 = vpack.i.bf16 %v727_v54, %v1894_v53  ;;  %v148_v57 = vld [vmem:[#allocation15] sm:$0xff] }
 0x454   :  { %v1140_v1 = vunpack.i.h.bf16 %v1138_v61  ;;  %v1139_v3 = vunpack.i.l.bf16 %v1138_v61  ;;  %v1837_v4 = vpack.i.bf16 %v584_v56, %v1833_v58  ;;  %v149_v56 = vld [vmem:[#allocation15 + $0x8] sm:$0xff] }
 0x455   :  { %959 = vmatpush3.bf16.msra.mxu0 %v469_v59  ;;  %v448_v38 = vsel %vm261_vm9, %v1174_v32, %v1175_v31 }
 0x456   :  { %v406_v6 = vsel %vm240_vm6, %v1139_v3, %v1140_v1  ;;  %1197 = vrot.lane.b32.xlu1 %v1837_v4, %s1560_s10  ;;  %1192 = vrot.lane.b32.xlu0 %v1837_v4, %s1558_s5 }
 0x457   :  { %v470_v9 = vpack.c.bf16 %v406_v6, %v400_v60  ;;  %v1148_v11 = vpop.permute.xlu1 %1147  ;;  %960 = vmatprep.subr.bf16.mxu0 %v1552_v0 }
 0x458   :  { %v1150_v14 = vunpack.i.h.bf16 %v1148_v11  ;;  %v1149_v15 = vunpack.i.l.bf16 %v1148_v11 }
 0x459   :  { %961 = vmatpush3.bf16.msra.mxu0 %v470_v9 }
 0x45a   :  { %v418_v16 = vsel %vm247_vm7, %v1149_v15, %v1150_v14  ;;  %1207 = vrot.lane.b32.xlu1 %v1837_v4, %s1562_s13  ;;  %1202 = vrot.lane.b32.xlu0 %v1837_v4, %s1557_s28 }
 0x45b   :  { %v471_v18 = vpack.c.bf16 %v418_v16, %v412_v10  ;;  %v1158_v21 = vpop.permute.xlu1 %1157  ;;  %962 = vmatprep.subr.bf16.mxu0 %v1552_v0 }
 0x45c   :  { %v1160_v24 = vunpack.i.h.bf16 %v1158_v21  ;;  %v1159_v25 = vunpack.i.l.bf16 %v1158_v21 }
 0x45d   :  { %963 = vmatpush3.bf16.msra.mxu0 %v471_v18 }
 0x45e   :  { %v430_v26 = vsel %vm254_vm8, %v1159_v25, %v1160_v24  ;;  %1217 = vrot.lane.b32.xlu1 %v1837_v4, %s1555_s7  ;;  %1212 = vrot.lane.b32.xlu0 %v1837_v4, %s1559_s9 }
 0x45f   :  { %v472_v27 = vpack.c.bf16 %v430_v26, %v424_v20  ;;  %v1168_v30 = vpop.permute.xlu1 %1167  ;;  %964 = vmatprep.subr.bf16.mxu0 %v1552_v0 }
 0x460   :  { %v1170_v33 = vunpack.i.h.bf16 %v1168_v30  ;;  %v1169_v7 = vunpack.i.l.bf16 %v1168_v30 }
 0x461   :  { %965 = vmatpush3.bf16.msra.mxu0 %v472_v27 }
 0x462   :  { %v442_v36 = vsel %vm261_vm9, %v1169_v7, %v1170_v33  ;;  %1227 = vrot.lane.b32.xlu1 %v1837_v4, %s1565_s19  ;;  %1222 = vrot.lane.b32.xlu0 %v1837_v4, %s1561_s11 }
 0x463   :  { %v473_v37 = vpack.c.bf16 %v442_v36, %v436_v28  ;;  %v1178_v39 = vpop.permute.xlu1 %1177  ;;  %966 = vmatprep.subr.bf16.mxu0 %v1552_v0 }
 0x464   :  { %v1180_v42 = vunpack.i.h.bf16 %v1178_v39  ;;  %v1179_v43 = vunpack.i.l.bf16 %v1178_v39 }
 0x465   :  { %967 = vmatpush3.bf16.msra.mxu0 %v473_v37 }
 0x466   :  { %v454_v44 = vsel %vm268_vm10, %v1179_v43, %v1180_v42  ;;  %1237 = vrot.lane.b32.xlu1 %v1837_v4, %s1567_s4  ;;  %1232 = vrot.lane.b32.xlu0 %v1837_v4, %s1563_s15 }
 0x467   :  { %v474_v45 = vpack.c.bf16 %v454_v44, %v448_v38  ;;  %v1188_v47 = vpop.permute.xlu1 %1187  ;;  %968 = vmatprep.subr.bf16.mxu0 %v1552_v0 }
 0x468   :  { %v1190_v48 = vunpack.i.h.bf16 %v1188_v47  ;;  %v1189_v8 = vunpack.i.l.bf16 %v1188_v47 }
 0x469   :  { %969 = vmatpush3.bf16.msra.mxu0 %v474_v45 }
 0x46a   :  { %v466_v49 = vsel %vm2004_vm2, %v1189_v8, %v1190_v48  ;;  %1247 = vrot.lane.b32.xlu1 %v1837_v4, %s1568_s14  ;;  %1242 = vrot.lane.b32.xlu0 %v1837_v4, %s1564_s16 }
 0x46b   :  { %v475_v50 = vpack.c.bf16 %v466_v49, %v460_v46  ;;  %970 = vmatprep.subr.bf16.mxu0 %v1552_v0 }
 0x46d   :  { %971 = vmatpush3.bf16.msra.mxu0 %v475_v50 }
 0x46e   :  { %1257 = vrot.lane.b32.xlu1 %v1837_v4, %s1569_s21  ;;  %1252 = vrot.lane.b32.xlu0 %v1837_v4, %s1566_s20 }
 0x46f   :  { %982 = vmatprep.subr.bf16.mxu0 %v1552_v0 }
 0x470   :  { %973 = vmatmul.mubr.bf16.vlgmr.msra.gmra.mrb[4].mxu0 %v1880_v51 }
 0x471   :  { %998 = vmatprep.mubr.msk.bf16.mxu0 %vm1553_vm0, %v1552_v0  ;;  %vm2005_vm0 = vmmov %vm2004_vm2 }
 0x472   :  { %1262 = vrot.lane.b32.xlu0 %v1261_v52, %s1558_s5  ;;  %1267 = vrot.lane.b32.xlu1 %v1266_v55, %s1558_s5 }
 0x476   :  { %1272 = vrot.lane.b32.xlu0 %v1261_v52, %s1560_s10  ;;  %1277 = vrot.lane.b32.xlu1 %v1266_v55, %s1560_s10 }
 0x47a   :  { %1282 = vrot.lane.b32.xlu0 %v1261_v52, %s1557_s28  ;;  %1287 = vrot.lane.b32.xlu1 %v1266_v55, %s1557_s28 }
 0x47e   :  { %1292 = vrot.lane.b32.xlu0 %v1261_v52, %s1562_s13  ;;  %1297 = vrot.lane.b32.xlu1 %v1266_v55, %s1562_s13 }
 0x482   :  { %1302 = vrot.lane.b32.xlu0 %v1261_v52, %s1559_s9  ;;  %1307 = vrot.lane.b32.xlu1 %v1266_v55, %s1559_s9 }
 0x486   :  { %1312 = vrot.lane.b32.xlu0 %v1261_v52, %s1555_s7  ;;  %1317 = vrot.lane.b32.xlu1 %v1266_v55, %s1555_s7 }
 0x48a   :  { %1322 = vrot.lane.b32.xlu0 %v1261_v52, %s1561_s11  ;;  %152 = vperm.xlu1 %1326, %v148_v57  }
 0x48e   :  { %157 = vperm.xlu0 %1055, %v149_v56  }
 0x4c8   :  { %v1193_v59 = vpop.permute.xlu0 %1192  ;;  %v1198_v60 = vpop.permute.xlu1 %1197 }
 0x4c9   :  { %v1195_v61 = vunpack.i.h.bf16 %v1193_v59  ;;  %v1194_v62 = vunpack.i.l.bf16 %v1193_v59  ;;  %v1200_v1 = vunpack.i.h.bf16 %v1198_v60  ;;  %v1199_v3 = vunpack.i.l.bf16 %v1198_v60 }
 0x4cb   :  { %v591_v63 = vsel %vm233_vm5, %v1194_v62, %v1195_v61  ;;  %v597_v11 = vsel %vm240_vm6, %v1199_v3, %v1200_v1 }
 0x4cc   :  { %v671_v4 = vpack.c.bf16 %v591_v63, %v1833_v58  ;;  %v1203_v5 = vpop.permute.xlu0 %1202  ;;  %v1208_v6 = vpop.permute.xlu1 %1207 }
 0x4cd   :  { %v1205_v9 = vunpack.i.h.bf16 %v1203_v5  ;;  %v1204_v10 = vunpack.i.l.bf16 %v1203_v5  ;;  %v1210_v13 = vunpack.i.h.bf16 %v1208_v6  ;;  %v1209_v14 = vunpack.i.l.bf16 %v1208_v6 }
 0x4ce   :  { %983 = vmatpush3.bf16.msra.mxu0 %v671_v4 }
 0x4cf   :  { %v603_v12 = vsel %vm247_vm7, %v1204_v10, %v1205_v9  ;;  %984 = vmatprep.subr.bf16.mxu0 %v1552_v0  ;;  %v609_v58 = vsel %vm254_vm8, %v1209_v14, %v1210_v13 }
 0x4d0   :  { %v672_v15 = vpack.c.bf16 %v603_v12, %v597_v11  ;;  %v1213_v16 = vpop.permute.xlu0 %1212  ;;  %v1218_v17 = vpop.permute.xlu1 %1217 }
 0x4d1   :  { %v1215_v18 = vunpack.i.h.bf16 %v1213_v16  ;;  %v1214_v20 = vunpack.i.l.bf16 %v1213_v16  ;;  %v1220_v22 = vunpack.i.h.bf16 %v1218_v17  ;;  %v1219_v23 = vunpack.i.l.bf16 %v1218_v17 }
 0x4d2   :  { %985 = vmatpush3.bf16.msra.mxu0 %v672_v15 }
 0x4d3   :  { %v615_v21 = vsel %vm261_vm9, %v1214_v20, %v1215_v18  ;;  %986 = vmatprep.subr.bf16.mxu0 %v1552_v0  ;;  %v621_v30 = vsel %vm268_vm10, %v1219_v23, %v1220_v22 }
 0x4d4   :  { %v673_v24 = vpack.c.bf16 %v615_v21, %v609_v58  ;;  %v1223_v25 = vpop.permute.xlu0 %1222  ;;  %v1228_v26 = vpop.permute.xlu1 %1227 }
 0x4d5   :  { %v1225_v27 = vunpack.i.h.bf16 %v1223_v25  ;;  %v1224_v28 = vunpack.i.l.bf16 %v1223_v25  ;;  %v1230_v32 = vunpack.i.h.bf16 %v1228_v26  ;;  %v1229_v33 = vunpack.i.l.bf16 %v1228_v26 }
 0x4d6   :  { %987 = vmatpush3.bf16.msra.mxu0 %v673_v24 }
 0x4d7   :  { %v627_v31 = vsel %vm2005_vm0, %v1224_v28, %v1225_v27  ;;  %988 = vmatprep.subr.bf16.mxu0 %v1552_v0  ;;  %v633_v39 = vsel %vm282_vm12, %v1229_v33, %v1230_v32 }
 0x4d8   :  { %v674_v7 = vpack.c.bf16 %v627_v31, %v621_v30  ;;  %v1233_v35 = vpop.permute.xlu0 %1232  ;;  %v1238_v36 = vpop.permute.xlu1 %1237 }
 0x4d9   :  { %v1235_v37 = vunpack.i.h.bf16 %v1233_v35  ;;  %v1234_v38 = vunpack.i.l.bf16 %v1233_v35  ;;  %v1240_v41 = vunpack.i.h.bf16 %v1238_v36  ;;  %v1239_v42 = vunpack.i.l.bf16 %v1238_v36 }
 0x4da   :  { %989 = vmatpush3.bf16.msra.mxu0 %v674_v7 }
 0x4db   :  { %v639_v40 = vsel %vm2006_vm4, %v1234_v38, %v1235_v37  ;;  %990 = vmatprep.subr.bf16.mxu0 %v1552_v0  ;;  %v645_v48 = vsel %vm296_vm14, %v1239_v42, %v1240_v41 }
 0x4dc   :  { %v675_v43 = vpack.c.bf16 %v639_v40, %v633_v39  ;;  %v1243_v44 = vpop.permute.xlu0 %1242  ;;  %v1248_v45 = vpop.permute.xlu1 %1247 }
 0x4dd   :  { %v1245_v46 = vunpack.i.h.bf16 %v1243_v44  ;;  %v1244_v47 = vunpack.i.l.bf16 %v1243_v44  ;;  %v1250_v49 = vunpack.i.h.bf16 %v1248_v45  ;;  %v1249_v50 = vunpack.i.l.bf16 %v1248_v45 }
 0x4de   :  { %991 = vmatpush3.bf16.msra.mxu0 %v675_v43 }
 0x4df   :  { %v651_v8 = vsel %vm303_vm15, %v1244_v47, %v1245_v46  ;;  %992 = vmatprep.subr.bf16.mxu0 %v1552_v0  ;;  %v657_v60 = vsel %vm310_vm3, %v1249_v50, %v1250_v49 }
 0x4e0   :  { %v676_v2 = vpack.c.bf16 %v651_v8, %v645_v48  ;;  %v1253_v52 = vpop.permute.xlu0 %1252  ;;  %v1258_v54 = vpop.permute.xlu1 %1257 }
 0x4e1   :  { %v1255_v55 = vunpack.i.h.bf16 %v1253_v52  ;;  %v1254_v56 = vunpack.i.l.bf16 %v1253_v52  ;;  %v1260_v57 = vunpack.i.h.bf16 %v1258_v54  ;;  %v1259_v59 = vunpack.i.l.bf16 %v1258_v54 }
 0x4e2   :  { %993 = vmatpush3.bf16.msra.mxu0 %v676_v2 }
 0x4e3   :  { %v663_v61 = vsel %vm317_vm13, %v1254_v56, %v1255_v55  ;;  %994 = vmatprep.subr.bf16.mxu0 %v1552_v0  ;;  %v669_v62 = vsel %vm324_vm11, %v1259_v59, %v1260_v57 }
 0x4e4   :  { %v677_v63 = vpack.c.bf16 %v663_v61, %v657_v60  ;;  %v678_v1 = vpack.c.bf16 %v669_v62, %v669_v62  ;;  %v1930_v4 = vpop.permute.xlu0 %1262  ;;  %v1268_v10 = vpop.permute.xlu1 %1267 }
 0x4e5   :  { %v1270_v13 = vunpack.i.h.bf16 %v1268_v10  ;;  %v1269_v14 = vunpack.i.l.bf16 %v1268_v10 }
 0x4e6   :  { %995 = vmatpush3.bf16.msra.mxu0 %v677_v63  ;;  %v680_v3 = vsel %vm174_vm1, %v678_v1, 0  ;;  %vm2007_vm1 = vmmov %vm2005_vm0 }
 0x4e7   :  { %996 = vmatprep.subr.bf16.mxu0 %v1552_v0  ;;  %v1938_v15 = vsel %vm233_vm5, %v1269_v14, %v1270_v13  ;;  %v1265_v14 = vunpack.i.h.bf16 %v1930_v4 }
 0x4e8   :  { %v1273_v5 = vpop.permute.xlu0 %1272  ;;  %v1278_v22 = vpop.permute.xlu1 %1277 }
 0x4e9   :  { %v1275_v6 = vunpack.i.h.bf16 %v1273_v5  ;;  %v1274_v9 = vunpack.i.l.bf16 %v1273_v5  ;;  %v1280_v24 = vunpack.i.h.bf16 %v1278_v22  ;;  %v1279_v25 = vunpack.i.l.bf16 %v1278_v22 }
 0x4ea   :  { %997 = vmatpush3.bf16.msra.mxu0 %v680_v3 }
 0x4eb   :  { %v1935_v11 = vsel %vm240_vm6, %v1274_v9, %v1275_v6  ;;  %v1946_v26 = vsel %vm240_vm6, %v1279_v25, %v1280_v24 }
 0x4ec   :  { %v1283_v12 = vpop.permute.xlu0 %1282  ;;  %v812_v16 = vpack.c.bf16 %v1935_v11, %v1938_v15  ;;  %v1288_v30 = vpop.permute.xlu1 %1287 }
 0x4ed   :  { %999 = vmatmul.mubr.msk.bf16.vlgmr.msra.gmra.mrb[8].mxu0 %vm282_vm12, %v1797_v29  ;;  %v1285_v18 = vunpack.i.h.bf16 %v1283_v12  ;;  %v1284_v20 = vunpack.i.l.bf16 %v1283_v12  ;;  %v1290_v33 = vunpack.i.h.bf16 %v1288_v30  ;;  %v1289_v7 = vunpack.i.l.bf16 %v1288_v30 }
 0x4ef   :  { %v1943_v23 = vsel %vm247_vm7, %v1284_v20, %v1285_v18  ;;  %v766_v36 = vsel %vm247_vm7, %v1289_v7, %v1290_v33 }
 0x4f0   :  { %v1293_v17 = vpop.permute.xlu0 %1292  ;;  %v813_v28 = vpack.c.bf16 %v1943_v23, %v1946_v26  ;;  %v1298_v40 = vpop.permute.xlu1 %1297 }
 0x4f1   :  { %v1295_v29 = vunpack.i.h.bf16 %v1293_v17  ;;  %v1294_v58 = vunpack.i.l.bf16 %v1293_v17  ;;  %v1300_v42 = vunpack.i.h.bf16 %v1298_v40  ;;  %v1299_v43 = vunpack.i.l.bf16 %v1298_v40 }
 0x4f2   :  { %v1264_v17 = vunpack.i.l.bf16 %v1930_v4 }
 0x4f3   :  { %v1949_v27 = vsel %vm254_vm8, %v1294_v58, %v1295_v29  ;;  %v778_v44 = vsel %vm254_vm8, %v1299_v43, %v1300_v42 }
 0x4f4   :  { %v1303_v21 = vpop.permute.xlu0 %1302  ;;  %v814_v39 = vpack.c.bf16 %v1949_v27, %v766_v36  ;;  %v1308_v48 = vpop.permute.xlu1 %1307  ;;  %v734_v23 = vsel %vm233_vm5, %v1264_v17, %v1265_v14 }
 0x4f5   :  { %v1305_v31 = vunpack.i.h.bf16 %v1303_v21  ;;  %v1304_v32 = vunpack.i.l.bf16 %v1303_v21  ;;  %v1310_v50 = vunpack.i.h.bf16 %v1308_v48  ;;  %v1309_v2 = vunpack.i.l.bf16 %v1308_v48 }
 0x4f6   :  { %v811_v25 = vpack.c.bf16 %v734_v23, %v1894_v53 }
 0x4f7   :  { %v784_v41 = vsel %vm261_vm9, %v1304_v32, %v1305_v31  ;;  %v790_v52 = vsel %vm261_vm9, %v1309_v2, %v1310_v50 }
 0x4f8   :  { %v1313_v35 = vpop.permute.xlu0 %1312  ;;  %v815_v47 = vpack.c.bf16 %v784_v41, %v778_v44  ;;  %v1318_v55 = vpop.permute.xlu1 %1317 }
 0x4f9   :  { %v1315_v37 = vunpack.i.h.bf16 %v1313_v35  ;;  %v1314_v38 = vunpack.i.l.bf16 %v1313_v35  ;;  %v1320_v57 = vunpack.i.h.bf16 %v1318_v55  ;;  %v1319_v59 = vunpack.i.l.bf16 %v1318_v55 }
 0x4fb   :  { %v796_v45 = vsel %vm268_vm10, %v1314_v38, %v1315_v37  ;;  %v802_v60 = vsel %vm268_vm10, %v1319_v59, %v1320_v57 }
 0x4fc   :  { %v1323_v46 = vpop.permute.xlu0 %1322  ;;  %v816_v54 = vpack.c.bf16 %v796_v45, %v790_v52 }
 0x4fd   :  { %v1325_v8 = vunpack.i.h.bf16 %v1323_v46  ;;  %v1324_v49 = vunpack.i.l.bf16 %v1323_v46 }
 0x4ff   :  { %v808_v56 = vsel %vm2007_vm1, %v1324_v49, %v1325_v8 }
 0x500   :  { %v817_v61 = vpack.c.bf16 %v808_v56, %v802_v60 }
 0x509   :  { %v153_v62 = vpop.permute.xlu1 %152 }
 0x50d   :  { %v158_v5 = vpop.permute.xlu0 %157 }
 0x543   :  { %v516_v63 = vpop.f32.mrb[4].mxu0 }
 0x544   :  { %v974_v1 = vpop.f32.mrb[5].mxu0  ;;  %v517_v3 = vadd.f32 %v516_v63, %v153_v62 }
 0x545   :  { %v519_v6 = vpop.f32.mrb[6].mxu0 }
 0x546   :  { %v520_v9 = vadd.f32 %v519_v6, %v158_v5  ;;  %v523_v10 = vmax.f32 %v517_v3, 0.0  ;;  %v975_v12 = vpop.f32.mrb[7].mxu0 }
 0x548   :  { %v524_v13 = vmax.f32 %v520_v9, 0.0  ;;  %525 = vst [vmem:[#allocation17] sm:$0xff] %v523_v10 }
 0x54a   :  { %526 = vst [vmem:[#allocation17 + $0x8] sm:$0xff] %v524_v13 }
 0x5c0   :  { %v716_v18 = vpop.f32.mrb[8].mxu0 }
 0x5c1   :  { %v717_v20 = vadd.f32 %v716_v18, %v1816_v34  ;;  %v1000_v29 = vpop.f32.mrb[9].mxu0 }
 0x5c2   :  { %v719_v58 = vpop.f32.mrb[10].mxu0 }
 0x5c3   :  { %v722_v21 = vmax.f32 %v717_v20, 0.0  ;;  %v1001_v22 = vpop.f32.mrb[11].mxu0 }
 0x5c5   :  { %v810_v24 = vpack.c.bf16 %v1766_v19, %v722_v21 }
 0x5c7   :  { %1003 = vmatpush3.bf16.msra.mxu1 %v810_v24 }
 0x5c8   :  { %1004 = vmatprep.subr.bf16.mxu1 %v1552_v0 }
 0x5cb   :  { %1005 = vmatpush3.bf16.msra.mxu1 %v811_v25 }
 0x5cc   :  { %1006 = vmatprep.subr.bf16.mxu1 %v1552_v0 }
 0x5cf   :  { %1007 = vmatpush3.bf16.msra.mxu1 %v812_v16 }
 0x5d0   :  { %1008 = vmatprep.subr.bf16.mxu1 %v1552_v0 }
 0x5d3   :  { %1009 = vmatpush3.bf16.msra.mxu1 %v813_v28 }
 0x5d4   :  { %1010 = vmatprep.subr.bf16.mxu1 %v1552_v0 }
 0x5d7   :  { %1011 = vmatpush3.bf16.msra.mxu1 %v814_v39 }
 0x5d8   :  { %1012 = vmatprep.subr.bf16.mxu1 %v1552_v0 }
 0x5db   :  { %1013 = vmatpush3.bf16.msra.mxu1 %v815_v47 }
 0x5dc   :  { %1014 = vmatprep.subr.bf16.mxu1 %v1552_v0 }
 0x5df   :  { %1015 = vmatpush3.bf16.msra.mxu1 %v816_v54 }
 0x5e0   :  { %1016 = vmatprep.subr.bf16.mxu1 %v1552_v0 }
 0x5e3   :  { %1017 = vmatpush3.bf16.msra.mxu1 %v817_v61 }
 0x5e6   :  { %1019 = vmatmul.mubr.bf16.vlgmr.msra.gmra.mrb[8].mxu1 %v1880_v51 }
 0x6b9   :  { %v852_v19 = vpop.f32.mrb[8].mxu1 }
 0x6ba   :  { %v853_v34 = vadd.f32 %v852_v19, %v153_v62  ;;  %v1020_v53 = vpop.f32.mrb[9].mxu1 }
 0x6bb   :  { %v855_v4 = vpop.f32.mrb[10].mxu1 }
 0x6bc   :  { %v859_v11 = vmax.f32 %v853_v34, 0.0  ;;  %v856_v15 = vadd.f32 %v855_v4, %v158_v5  ;;  %v1021_v16 = vpop.f32.mrb[11].mxu1 }
 0x6be   :  { %862 = vst [vmem:[#allocation17 + $0x10] sm:$0xff] %v859_v11  ;;  %v860_v26 = vmax.f32 %v856_v15, 0.0 }
 0x6c0   :  { %863 = vst [vmem:[#allocation17 + $0x18] sm:$0xff] %v860_v26 }
 0x6c1   :  { %1515 = shalt.err (!%p1512_p12)
}
 0x6c2   :  { %s1516_s12 = scalar_lea.hbm %s2001_s8, 512 }
 0x6c3   :  { %p1517_p13 = scmp.ne.s32.totalorder %s2001_s8, %s1516_s12  ;;  %p1520_p0 = scmp.lt.u32.totalorder %s1516_s12, %s2001_s8 }
 0x6c5   :  { %p1522_p1 = pnand %p1520_p0, %p1517_p13 }
 0x6c7   :  { %1525 = shalt.err (!%p1522_p1)
}
 0x6c8   :  { %875 = dma.vmem_to_hbm [thread:$0]  %s870_s30, 512, %s2001_s8, [#allocation5], %s1550_s6, %s1550_s6, %s1551_s27  }
 0x6c9   :  { %1536 = dma.done.wait [#allocation5], 512  }
 0x6ca   :  { %1537 = vsyncadd [#allocation5], 4294966784 }
 0x6cb   :  { %879 = vsyncpa [#allocation4], 1 }
 0x6cc   :  { %880 = vsyncpa [#allocation7], 1 }
 0x6cd   :  { %881 = vsyncpa [#allocation10], 1 }
 0x6ce   :  { %882 = vsyncpa [#allocation13], 1 }
 0x6cf   :  { %883 = vsyncpa [#allocation16], 1 }
 0x6d0   :  { %884 = vsyncpa [#allocation5], 1 }

</bundles_post_ra>
